<compile_context>
chip_gen: v7x
topology: tpu7x:2x2x1
jax: 0.10.0
libtpu: 0.0.40
codegen_flags: <defaults>
</compile_context>

<pallas_src>
import jax
import jax.numpy as jnp
from jax.experimental import pallas as pl
from jax.experimental.pallas import tpu as pltpu


def mlp_kernel(x_ref, wi_ref, wh_ref, wo_ref, o_ref):
    # x:   (TB, In)  f32 in HBM -> cast to bf16 in VMEM (operand cast only)
    # wi:  (In, H)   bf16, pre-transposed in the wrapper
    # wh:  (H,  H)   bf16
    # wo:  (H,  O)   bf16
    # out: (TB, O)   f32
    x = x_ref[...].astype(jnp.bfloat16)

    # layer 1: x @ Wi^T  (Wi pre-transposed), f32 accumulate, ReLU in f32
    h1 = jnp.dot(x, wi_ref[...], preferred_element_type=jnp.float32)
    h1 = jnp.maximum(h1, 0.0).astype(jnp.bfloat16)

    # layer 2: h1 @ Wh^T, f32 accumulate, ReLU in f32
    h2 = jnp.dot(h1, wh_ref[...], preferred_element_type=jnp.float32)
    h2 = jnp.maximum(h2, 0.0).astype(jnp.bfloat16)

    # layer 3: h2 @ Wo^T (no activation), f32 accumulate
    out = jnp.dot(h2, wo_ref[...], preferred_element_type=jnp.float32)
    o_ref[...] = out.astype(o_ref.dtype)


def _pick_batch_tile(B, tb_req):
    """Pick a batch tile that is a multiple of 16 (bf16 sublane packing) and
    divides B so no padding / ragged last tile is needed."""
    tb = min(tb_req, B)
    tb = max(16, (tb // 16) * 16)
    while tb > 16 and B % tb != 0:
        tb -= 16
    return tb


def mlp_forward(x, input_weight, hidden_weight, output_weight, *, tb=1024):
    """Forward pass matching PyTorch MLP.forward (F.linear w/o bias, ReLU, x2, linear).

    Weights follow the PyTorch F.linear convention: W has shape (out_features, in_features).
    Matmul operands are bf16, accumulation is f32.
    """
    B, In = x.shape
    H = input_weight.shape[0]
    O = output_weight.shape[0]

    # Pre-transpose + downcast weights once outside the kernel (trace-time XLA op;
    # in real use the weights would simply be stored in this layout/dtype).
    wi_t = input_weight.T.astype(jnp.bfloat16)    # (In, H)
    wh_t = hidden_weight.T.astype(jnp.bfloat16)   # (H,  H)
    wo_t = output_weight.T.astype(jnp.bfloat16)   # (H,  O)

    tb = _pick_batch_tile(B, tb)
    if B % tb != 0:
        # Fallback only for B not a multiple of 16: pad once (garbage rows are
        # row-independent and sliced off below).
        # TODO(synk): mask the last tile's store instead of padding for very large ragged B.
        Bp = pl.cdiv(B, tb) * tb
        x = jnp.pad(x, ((0, Bp - B), (0, 0)))
    else:
        Bp = B
    num_tiles = Bp // tb

    flops = 2 * Bp * (In * H + H * H + H * O)
    bytes_accessed = (
        Bp * In * x.dtype.itemsize          # x read
        + Bp * O * x.dtype.itemsize         # out write
        + 2 * (In * H + H * H + H * O)      # bf16 weights read once
    )

    out = pl.pallas_call(
        mlp_kernel,
        out_shape=jax.ShapeDtypeStruct((Bp, O), x.dtype),
        grid=(num_tiles,),
        in_specs=[
            pl.BlockSpec((tb, In), lambda i: (i, 0)),   # x tile marches over batch
            pl.BlockSpec((In, H), lambda i: (0, 0)),    # weights: constant block index
            pl.BlockSpec((H, H), lambda i: (0, 0)),     #   -> DMA'd once, VMEM-resident
            pl.BlockSpec((H, O), lambda i: (0, 0)),
        ],
        out_specs=pl.BlockSpec((tb, O), lambda i: (i, 0)),
        compiler_params=pltpu.CompilerParams(
            dimension_semantics=("parallel",),  # true data-parallel axis (v7x megacore)
        ),
        cost_estimate=pl.CostEstimate(
            flops=flops, transcendentals=0, bytes_accessed=bytes_accessed),
    )(x, wi_t, wh_t, wo_t)

    return out[:B] if Bp != B else out


def mlp_reference(x, wi, wh, wo):
    h1 = jnp.maximum(x @ wi.T, 0.0)
    h2 = jnp.maximum(h1 @ wh.T, 0.0)
    return h2 @ wo.T


if __name__ == "__main__":
    # Shapes consistent with the module: x = torch.rand(128, 1024),
    # MLP(input_size=1024, hidden_size=256, output_size=128).
    B, IN, HID, OUT = 128, 1024, 256, 128

    key = jax.random.PRNGKey(0)
    kx, k1, k2, k3 = jax.random.split(key, 4)

    x = jax.random.uniform(kx, (B, IN), dtype=jnp.float32)                # torch.rand analogue
    input_weight = jax.random.normal(k1, (HID, IN), dtype=jnp.float32)    # torch.randn(hidden, input)
    hidden_weight = jax.random.normal(k2, (HID, HID), dtype=jnp.float32)  # torch.randn(hidden, hidden)
    output_weight = jax.random.normal(k3, (OUT, HID), dtype=jnp.float32)  # torch.randn(output, hidden)

    out = mlp_forward(x, input_weight, hidden_weight, output_weight)
    jax.block_until_ready(out)
    assert out.shape == (B, OUT)

    # Reference in f32; kernel uses bf16 operands with f32 accumulation, so use a
    # relative-error check rather than the tight f32 tolerance.
    ref = mlp_reference(x, input_weight, hidden_weight, output_weight)
    rel_err = jnp.max(jnp.abs(out - ref)) / (jnp.max(jnp.abs(ref)) + 1e-6)
    assert float(rel_err) < 2e-2, f"Pallas output mismatch vs reference (rel_err={float(rel_err)})"

    print("KERNEL_OK")
</pallas_src>

<mosaic_0001>
module attributes {stable_mosaic.version = 11 : i64} {
  func.func @mlp_kernel(%arg0: i32, %arg1: memref<128x1024xf32, #tpu.memory_space<vmem>>, %arg2: memref<1024x256xbf16, #tpu.memory_space<vmem>>, %arg3: memref<256x256xbf16, #tpu.memory_space<vmem>>, %arg4: memref<256x128xbf16, #tpu.memory_space<vmem>>, %arg5: memref<128x128xf32, #tpu.memory_space<vmem>>) attributes {dimension_semantics = [#tpu.dimension_semantics<parallel>], iteration_bounds = array<i64: 1>, scalar_prefetch = 0 : i64, scratch_operands = 0 : i64, tpu.core_type = #tpu.core_type<tc>, window_params = [{transform_indices = @transform_0, window_bounds = array<i64: 128, 1024>}, {pipeline_mode = #tpu.pipeline_mode<synchronous>, transform_indices = @transform_1, window_bounds = array<i64: 1024, 256>}, {pipeline_mode = #tpu.pipeline_mode<synchronous>, transform_indices = @transform_2, window_bounds = array<i64: 256, 256>}, {pipeline_mode = #tpu.pipeline_mode<synchronous>, transform_indices = @transform_3, window_bounds = array<i64: 256, 128>}, {transform_indices = @transform_4, window_bounds = array<i64: 128, 128>}]} {
    %c0 = arith.constant 0 : index
    %c0_0 = arith.constant 0 : index
    %0 = vector.load %arg1[%c0, %c0_0] : memref<128x1024xf32, #tpu.memory_space<vmem>>, vector<128x1024xf32>
    %1 = arith.truncf %0 : vector<128x1024xf32> to vector<128x1024xbf16>
    %c0_1 = arith.constant 0 : index
    %c0_2 = arith.constant 0 : index
    %2 = vector.load %arg2[%c0_1, %c0_2] : memref<1024x256xbf16, #tpu.memory_space<vmem>>, vector<1024x256xbf16>
    %cst = arith.constant dense<0.000000e+00> : vector<128x256xf32>
    %3 = tpu.matmul %1, %2, %cst {dimension_numbers = #tpu.dot_dimension_numbers<[1], [0], [0], [1], [0, 0, 1, 1], [], []>} : vector<128x1024xbf16>, vector<1024x256xbf16>, vector<128x256xf32> -> vector<128x256xf32>
    %cst_3 = arith.constant 0.000000e+00 : f32
    %4 = vector.broadcast %cst_3 : f32 to vector<128x256xf32>
    %5 = arith.maximumf %3, %4 : vector<128x256xf32>
    %6 = arith.truncf %5 : vector<128x256xf32> to vector<128x256xbf16>
    %c0_4 = arith.constant 0 : index
    %c0_5 = arith.constant 0 : index
    %7 = vector.load %arg3[%c0_4, %c0_5] : memref<256x256xbf16, #tpu.memory_space<vmem>>, vector<256x256xbf16>
    %cst_6 = arith.constant dense<0.000000e+00> : vector<128x256xf32>
    %8 = tpu.matmul %6, %7, %cst_6 {dimension_numbers = #tpu.dot_dimension_numbers<[1], [0], [0], [1], [0, 0, 1, 1], [], []>} : vector<128x256xbf16>, vector<256x256xbf16>, vector<128x256xf32> -> vector<128x256xf32>
    %cst_7 = arith.constant 0.000000e+00 : f32
    %9 = vector.broadcast %cst_7 : f32 to vector<128x256xf32>
    %10 = arith.maximumf %8, %9 : vector<128x256xf32>
    %11 = arith.truncf %10 : vector<128x256xf32> to vector<128x256xbf16>
    %c0_8 = arith.constant 0 : index
    %c0_9 = arith.constant 0 : index
    %12 = vector.load %arg4[%c0_8, %c0_9] : memref<256x128xbf16, #tpu.memory_space<vmem>>, vector<256x128xbf16>
    %cst_10 = arith.constant dense<0.000000e+00> : vector<128x128xf32>
    %13 = tpu.matmul %11, %12, %cst_10 {dimension_numbers = #tpu.dot_dimension_numbers<[1], [0], [0], [1], [0, 0, 1, 1], [], []>} : vector<128x256xbf16>, vector<256x128xbf16>, vector<128x128xf32> -> vector<128x128xf32>
    %c0_11 = arith.constant 0 : index
    %c0_12 = arith.constant 0 : index
    %14 = vector.load %arg5[%c0_11, %c0_12] : memref<128x128xf32, #tpu.memory_space<vmem>>, vector<128x128xf32>
    tpu.vector_store %arg5[%c0_11, %c0_12], %13 {strides = array<i32>} : memref<128x128xf32, #tpu.memory_space<vmem>>, vector<128x128xf32>,
    return
  }
  func.func @transform_0(%arg0: i32) -> (i32, i32) {
    %c0_i32 = arith.constant 0 : i32
    %c0_i32_0 = arith.constant 0 : i32
    return %arg0, %c0_i32 : i32, i32
  }
  func.func @transform_1(%arg0: i32) -> (i32, i32) {
    %c0_i32 = arith.constant 0 : i32
    %c0_i32_0 = arith.constant 0 : i32
    %c0_i32_1 = arith.constant 0 : i32
    return %c0_i32, %c0_i32_0 : i32, i32
  }
  func.func @transform_2(%arg0: i32) -> (i32, i32) {
    %c0_i32 = arith.constant 0 : i32
    %c0_i32_0 = arith.constant 0 : i32
    %c0_i32_1 = arith.constant 0 : i32
    return %c0_i32, %c0_i32_0 : i32, i32
  }
  func.func @transform_3(%arg0: i32) -> (i32, i32) {
    %c0_i32 = arith.constant 0 : i32
    %c0_i32_0 = arith.constant 0 : i32
    %c0_i32_1 = arith.constant 0 : i32
    return %c0_i32, %c0_i32_0 : i32, i32
  }
  func.func @transform_4(%arg0: i32) -> (i32, i32) {
    %c0_i32 = arith.constant 0 : i32
    %c0_i32_0 = arith.constant 0 : i32
    return %arg0, %c0_i32 : i32, i32
  }
}

</mosaic_0001>

<bundles_post_ra>
// kernel: tpu_custom_call.1
= control target key start
LH: loop header
LB: loop body
LE: loop exit
PB: predicated region body
PF: predicated region fallthrough
CT: control target
= control target key end

     0   :  { %9 = vsyncpa [#allocation3], 0  ;;  %s3053_s0 = inlined_call_operand.hbm [shape: f32[128,1024], index: 0, kind: input, shape index: {}]   ;;  %s3054_s1 = inlined_call_operand.hbm [shape: bf16[1024,256], index: 1, kind: input, shape index: {}]   ;;  %s3055_s2 = inlined_call_operand.hbm [shape: bf16[256,256], index: 2, kind: input, shape index: {}]   ;;  %s3056_s3 = inlined_call_operand.hbm [shape: bf16[256,128], index: 3, kind: input, shape index: {}]   ;;  %s3057_s4 = inlined_call_operand.hbm [shape: f32[128,128], index: 4, kind: output, shape index: {}]  }
   0x1   :  { %10 = vsyncpa [#allocation6], 0 }
   0x2   :  { %11 = vsyncpa [#allocation9], 0 }
   0x3   :  { %12 = vsyncpa [#allocation4], 0  ;;  %s2867_s15 = smov [#allocation5]   ;;  %s2749_s19 = scalar_lea.hbm %s3054_s1, 16384 }
   0x4   :  { %s30_s16 = sshll.u32 %s2867_s15, 4  ;;  %p2750_p0 = scmp.ne.s32.totalorder %s3054_s1, %s2749_s19  ;;  %s31_s16 = int_to_ptr.vmem [resolvable:$true] %s30_s16 }
   0x5   :  { %p2753_p1 = scmp.lt.u32.totalorder %s2749_s19, %s3054_s1 }
   0x7   :  { %p2755_p2 = pnand %p2753_p1, %p2750_p0 }
   0x9   :  { %2758 = shalt.err (!%p2755_p2)
}
   0xa   :  { %s2759_s24 = scalar_lea.vmem %s31_s16, 16384  ;;  %p2764_p4 = scmp.lt.s32.totalorder %s31_s16, %s31_s16 }
   0xb   :  { %p2760_p3 = scmp.ne.s32.totalorder %s31_s16, %s2759_s24  ;;  %p2765_p5 = scmp.lt.s32.totalorder %s2759_s24, %s2759_s24 }
   0xd   :  { %p2766_p6 = por %p2765_p5, %p2764_p4 }
   0xf   :  { %p2767_p7 = pnand %p2766_p6, %p2760_p3 }
  0x11   :  { %2770 = shalt.err (!%p2767_p7)
}
  0x12   :  { %s2868_s25 = smov 128   ;;  %s2869_s26 = smov 8  }
  0x13   :  { %36 = dma.hbm_to_vmem [thread:$0]  %s3054_s1, 16384, %s31_s16, [#allocation6], %s2868_s25, %s2868_s25, %s2869_s26  }
  0x14   :  { %s2870_s29 = smov [#allocation2]   ;;  %s2771_s7 = scalar_lea.hbm %s3053_s0, 16384 }
  0x15   :  { %s18_s30 = sshll.u32 %s2870_s29, 4  ;;  %p2772_p8 = scmp.ne.s32.totalorder %s3053_s0, %s2771_s7  ;;  %s19_s30 = int_to_ptr.vmem [resolvable:$true] %s18_s30 }
  0x16   :  { %p2775_p9 = scmp.lt.u32.totalorder %s2771_s7, %s3053_s0 }
  0x18   :  { %p2777_p10 = pnand %p2775_p9, %p2772_p8 }
  0x1a   :  { %2780 = shalt.err (!%p2777_p10)
}
  0x1b   :  { %s2781_s12 = scalar_lea.vmem %s19_s30, 16384  ;;  %p2786_p12 = scmp.lt.s32.totalorder %s19_s30, %s19_s30 }
  0x1c   :  { %p2782_p11 = scmp.ne.s32.totalorder %s19_s30, %s2781_s12  ;;  %p2787_p13 = scmp.lt.s32.totalorder %s2781_s12, %s2781_s12 }
  0x1e   :  { %p2788_p0 = por %p2787_p13, %p2786_p12 }
  0x20   :  { %p2789_p1 = pnand %p2788_p0, %p2782_p11 }
  0x22   :  { %2792 = shalt.err (!%p2789_p1)
}
  0x23   :  { %s2871_s1 = smov 1024   ;;  %s2872_s13 = smov 64  }
  0x24   :  { %24 = dma.hbm_to_vmem [thread:$0]  %s3053_s0, 16384, %s19_s30, [#allocation3], %s2871_s1, %s2871_s1, %s2872_s13  }
  0x25   :  { %s2873_s16 = smov [#allocation7]   ;;  %s2874_s18 = smov [#allocation8]  }
  0x26   :  { %s42_s17 = sshll.u32 %s2873_s16, 4  ;;  %s54_s19 = sshll.u32 %s2874_s18, 4  ;;  %s43_s17 = int_to_ptr.vmem [resolvable:$true] %s42_s17  ;;  %s2930_s19 = int_to_ptr.vmem [resolvable:$true] %s54_s19 }
  0x27   :  { %s2793_s22 = scalar_lea.hbm %s3055_s2, 4096 }
  0x28   :  { %p2794_p2 = scmp.ne.s32.totalorder %s3055_s2, %s2793_s22  ;;  %p2797_p3 = scmp.lt.u32.totalorder %s2793_s22, %s3055_s2 }
  0x2a   :  { %p2799_p4 = pnand %p2797_p3, %p2794_p2 }
  0x2c   :  { %2802 = shalt.err (!%p2799_p4)
}
  0x2d   :  { %s2803_s0 = scalar_lea.vmem %s43_s17, 4096  ;;  %p2808_p6 = scmp.lt.s32.totalorder %s43_s17, %s43_s17 }
  0x2e   :  { %p2804_p5 = scmp.ne.s32.totalorder %s43_s17, %s2803_s0  ;;  %p2809_p7 = scmp.lt.s32.totalorder %s2803_s0, %s2803_s0 }
  0x30   :  { %p2810_p8 = por %p2809_p7, %p2808_p6 }
  0x32   :  { %p2811_p9 = pnand %p2810_p8, %p2804_p5 }
  0x34   :  { %2814 = shalt.err (!%p2811_p9)
}
  0x35   :  { %48 = dma.hbm_to_vmem [thread:$0]  %s3055_s2, 4096, %s43_s17, [#allocation6], %s2868_s25, %s2868_s25, %s2869_s26  }
  0x36   :  { %s2815_s7 = scalar_lea.hbm %s3056_s3, 2048 }
  0x37   :  { %p2816_p10 = scmp.ne.s32.totalorder %s3056_s3, %s2815_s7  ;;  %p2819_p11 = scmp.lt.u32.totalorder %s2815_s7, %s3056_s3 }
  0x39   :  { %p2821_p12 = pnand %p2819_p11, %p2816_p10 }
  0x3b   :  { %2824 = shalt.err (!%p2821_p12)
}
  0x3c   :  { %s2825_s12 = scalar_lea.vmem %s2930_s19, 2048  ;;  %p2830_p0 = scmp.lt.s32.totalorder %s2930_s19, %s2930_s19 }
  0x3d   :  { %p2826_p13 = scmp.ne.s32.totalorder %s2930_s19, %s2825_s12  ;;  %p2831_p1 = scmp.lt.s32.totalorder %s2825_s12, %s2825_s12 }
  0x3f   :  { %p2832_p2 = por %p2831_p1, %p2830_p0 }
  0x41   :  { %p2833_p3 = pnand %p2832_p2, %p2826_p13 }
  0x43   :  { %2836 = shalt.err (!%p2833_p3)
}
  0x44   :  { %s2875_s2 = smov 4  }
  0x45   :  { %60 = dma.hbm_to_vmem [thread:$0]  %s3056_s3, 2048, %s2930_s19, [#allocation9], %s2872_s13, %s2872_s13, %s2875_s2  }
  0x46   :  { %2859 = dma.done.wait [#allocation3], 16384  }
  0x47   :  { %2860 = vsyncadd [#allocation3], 4294950912 }
  0x48   :  { %2861 = dma.done.wait [#allocation6], 20480  }
  0x49   :  { %2862 = vsyncadd [#allocation6], 4294946816 }
  0x4a   :  { %2863 = dma.done.wait [#allocation9], 2048  }
  0x4b   :  { %2864 = vsyncadd [#allocation9], 4294965248  ;;  %v2493_v0 = vld [vmem:[#allocation5 + $0x104] ss:$8 sps:$4 sm:$0xff]   ;;  %v2495_v1 = vld [vmem:[#allocation5 + $0x100] ss:$8 sps:$4 sm:$0xff]  }
  0x4c   :  { %1147 = vmatprep.subr.bf16.mxu0 %v2493_v0  ;;  %v2496_v2 = vld [vmem:[#allocation5 + $0x114] ss:$8 sps:$4 sm:$0xff]   ;;  %v2498_v3 = vld [vmem:[#allocation5 + $0x110] ss:$8 sps:$4 sm:$0xff]   ;;  %v2499_v4 = vld [vmem:[#allocation5 + $0x124] ss:$8 sps:$4 sm:$0xff]  }
  0x4d   :  { %1148 = vmatpush1.bf16.msra.mxu0 %v2495_v1  ;;  %v2501_v5 = vld [vmem:[#allocation5 + $0x120] ss:$8 sps:$4 sm:$0xff]   ;;  %v2502_v6 = vld [vmem:[#allocation5 + $0x134] ss:$8 sps:$4 sm:$0xff]   ;;  %v2504_v7 = vld [vmem:[#allocation5 + $0x130] ss:$8 sps:$4 sm:$0xff]  }
  0x4e   :  { %1149 = vmatprep.subr.bf16.mxu0 %v2496_v2  ;;  %v2505_v8 = vld [vmem:[#allocation5 + $0x144] ss:$8 sps:$4 sm:$0xff]   ;;  %v2507_v9 = vld [vmem:[#allocation5 + $0x140] ss:$8 sps:$4 sm:$0xff]   ;;  %v2508_v10 = vld [vmem:[#allocation5 + $0x154] ss:$8 sps:$4 sm:$0xff]  }
  0x4f   :  { %v2510_v11 = vld [vmem:[#allocation5 + $0x150] ss:$8 sps:$4 sm:$0xff]   ;;  %v2511_v12 = vld [vmem:[#allocation5 + $0x164] ss:$8 sps:$4 sm:$0xff]   ;;  %v2513_v16 = vld [vmem:[#allocation5 + $0x160] ss:$8 sps:$4 sm:$0xff]  }
  0x50   :  { %v77_v13 = vld [vmem:[#allocation2 + $0x18] sm:$0xff]  ;;  %v2517_v19 = vld [vmem:[#allocation5 + $0x184] ss:$8 sps:$4 sm:$0xff]   ;;  %v2519_v20 = vld [vmem:[#allocation5 + $0x180] ss:$8 sps:$4 sm:$0xff]   ;;  %s2876_s3 = smov [#allocation10]  }
  0x51   :  { %1150 = vmatpush1.bf16.msra.mxu0 %v2498_v3  ;;  %v85_v14 = vld [vmem:[#allocation2 + $0x58] sm:$0xff]  ;;  %v2523_v23 = vld [vmem:[#allocation5 + $0x1a4] ss:$8 sps:$4 sm:$0xff]   ;;  %v2525_v24 = vld [vmem:[#allocation5 + $0x1a0] ss:$8 sps:$4 sm:$0xff]   ;;  %s2133_s13 = sshll.u32 %s2876_s3, 4  ;;  %s2134_s13 = int_to_ptr.vmem [resolvable:$true] %s2133_s13 }
  0x52   :  { %1151 = vmatprep.subr.bf16.mxu0 %v2499_v4  ;;  %v205_v15 = vpack.c.bf16 %v85_v14, %v77_v13  ;;  %v2514_v17 = vld [vmem:[#allocation5 + $0x174] ss:$8 sps:$4 sm:$0xff]   ;;  %v2516_v18 = vld [vmem:[#allocation5 + $0x170] ss:$8 sps:$4 sm:$0xff]   ;;  %v2529_v27 = vld [vmem:[#allocation5 + $0x1c4] ss:$8 sps:$4 sm:$0xff]   ;;  %p2842_p5 = scmp.lt.s32.totalorder %s2134_s13, %s2134_s13 }
  0x53   :  { %v2520_v21 = vld [vmem:[#allocation5 + $0x194] ss:$8 sps:$4 sm:$0xff]   ;;  %v2522_v22 = vld [vmem:[#allocation5 + $0x190] ss:$8 sps:$4 sm:$0xff]   ;;  %v2531_v28 = vld [vmem:[#allocation5 + $0x1c0] ss:$8 sps:$4 sm:$0xff]  }
  0x54   :  { %1179 = vmatprep.mubr.bf16.mxu0 %v205_v15  ;;  %v2526_v25 = vld [vmem:[#allocation5 + $0x1b4] ss:$8 sps:$4 sm:$0xff]   ;;  %v2528_v26 = vld [vmem:[#allocation5 + $0x1b0] ss:$8 sps:$4 sm:$0xff]   ;;  %v2535_v31 = vld [vmem:[#allocation5 + $0x1e4] ss:$8 sps:$4 sm:$0xff]  }
  0x55   :  { %1152 = vmatpush1.bf16.msra.mxu0 %v2501_v5  ;;  %v2532_v29 = vld [vmem:[#allocation5 + $0x1d4] ss:$8 sps:$4 sm:$0xff]   ;;  %v2534_v30 = vld [vmem:[#allocation5 + $0x1d0] ss:$8 sps:$4 sm:$0xff]   ;;  %v2589_v32 = vld [vmem:[#allocation5 + $0x4] ss:$8 sps:$4 sm:$0xff]  }
  0x56   :  { %1153 = vmatprep.subr.bf16.mxu0 %v2502_v6  ;;  %v2591_v33 = vld [vmem:[#allocation5] ss:$8 sps:$4 sm:$0xff]   ;;  %v2538_v35 = vld [vmem:[#allocation5 + $0x1f4] ss:$8 sps:$4 sm:$0xff]   ;;  %1034 = vmatprep.subr.bf16.mxu1 %v2589_v32  ;;  %v2540_v36 = vld [vmem:[#allocation5 + $0x1f0] ss:$8 sps:$4 sm:$0xff]  }
  0x57   :  { %v2537_v34 = vld [vmem:[#allocation5 + $0x1e0] ss:$8 sps:$4 sm:$0xff]   ;;  %v76_v37 = vld [vmem:[#allocation2 + $0x10] sm:$0xff]  ;;  %1035 = vmatpush1.bf16.msra.mxu1 %v2591_v33  ;;  %v2543_v39 = vld [vmem:[#allocation5 + $0x204] ss:$8 sps:$4 sm:$0xff]   ;;  %s2837_s15 = scalar_lea.vmem %s2134_s13, 2048 }
  0x58   :  { %v84_v38 = vld [vmem:[#allocation2 + $0x50] sm:$0xff]  ;;  %v93_v42 = vld [vmem:[#allocation2 + $0x98] sm:$0xff]  ;;  %v2601_v44 = vld [vmem:[#allocation5 + $0x24] ss:$8 sps:$4 sm:$0xff]   ;;  %p2838_p4 = scmp.ne.s32.totalorder %s2134_s13, %s2837_s15  ;;  %p2843_p6 = scmp.lt.s32.totalorder %s2837_s15, %s2837_s15 }
  0x59   :  { %1154 = vmatpush1.bf16.msra.mxu0 %v2504_v7  ;;  %v2595_v40 = vld [vmem:[#allocation5 + $0x14] ss:$8 sps:$4 sm:$0xff]   ;;  %v2597_v41 = vld [vmem:[#allocation5 + $0x10] ss:$8 sps:$4 sm:$0xff]   ;;  %v2603_v45 = vld [vmem:[#allocation5 + $0x20] ss:$8 sps:$4 sm:$0xff]   ;;  %v204_v46 = vpack.c.bf16 %v84_v38, %v76_v37 }
  0x5a   :  { %1155 = vmatprep.subr.bf16.mxu0 %v2505_v8  ;;  %v101_v43 = vld [vmem:[#allocation2 + $0xd8] sm:$0xff]  ;;  %1036 = vmatprep.subr.bf16.mxu1 %v2595_v40  ;;  %v2541_v47 = vld [vmem:[#allocation5 + $0x200] ss:$8 sps:$4 sm:$0xff]   ;;  %v92_v53 = vld [vmem:[#allocation2 + $0x90] sm:$0xff]  ;;  %p2844_p7 = por %p2843_p6, %p2842_p5 }
  0x5b   :  { %1037 = vmatpush1.bf16.msra.mxu1 %v2597_v41  ;;  %v2546_v48 = vld [vmem:[#allocation5 + $0x214] ss:$8 sps:$4 sm:$0xff]   ;;  %v213_v49 = vpack.c.bf16 %v101_v43, %v93_v42  ;;  %v2609_v51 = vld [vmem:[#allocation5 + $0x30] ss:$8 sps:$4 sm:$0xff]   ;;  %v2613_v55 = vld [vmem:[#allocation5 + $0x44] ss:$8 sps:$4 sm:$0xff]  }
  0x5c   :  { %1038 = vmatprep.subr.bf16.mxu1 %v2601_v44  ;;  %v2607_v50 = vld [vmem:[#allocation5 + $0x34] ss:$8 sps:$4 sm:$0xff]   ;;  %v2544_v52 = vld [vmem:[#allocation5 + $0x210] ss:$8 sps:$4 sm:$0xff]   ;;  %v2549_v56 = vld [vmem:[#allocation5 + $0x224] ss:$8 sps:$4 sm:$0xff]   ;;  %p2845_p8 = pnand %p2844_p7, %p2838_p4 }
  0x5d   :  { %1156 = vmatpush1.bf16.msra.mxu0 %v2507_v9  ;;  %v100_v54 = vld [vmem:[#allocation2 + $0xd0] sm:$0xff]  ;;  %v109_v57 = vld [vmem:[#allocation2 + $0x118] sm:$0xff]  ;;  %v2615_v59 = vld [vmem:[#allocation5 + $0x40] ss:$8 sps:$4 sm:$0xff]  }
  0x5e   :  { %1157 = vmatprep.subr.bf16.mxu0 %v2508_v10  ;;  %v117_v58 = vld [vmem:[#allocation2 + $0x158] sm:$0xff]  ;;  %v212_v60 = vpack.c.bf16 %v100_v54, %v92_v53  ;;  %v2547_v61 = vld [vmem:[#allocation5 + $0x220] ss:$8 sps:$4 sm:$0xff]   ;;  %v108_v3 = vld [vmem:[#allocation2 + $0x110] sm:$0xff] }
  0x5f   :  { %1039 = vmatpush1.bf16.msra.mxu1 %v2603_v45  ;;  %v221_v62 = vpack.c.bf16 %v117_v58, %v109_v57  ;;  %v2619_v63 = vld [vmem:[#allocation5 + $0x54] ss:$8 sps:$4 sm:$0xff]   ;;  %v2621_v1 = vld [vmem:[#allocation5 + $0x50] ss:$8 sps:$4 sm:$0xff]   ;;  %v2625_v4 = vld [vmem:[#allocation5 + $0x64] ss:$8 sps:$4 sm:$0xff]  }
  0x60   :  { %1040 = vmatprep.subr.bf16.mxu1 %v2607_v50  ;;  %v2552_v0 = vld [vmem:[#allocation5 + $0x234] ss:$8 sps:$4 sm:$0xff]   ;;  %v2550_v2 = vld [vmem:[#allocation5 + $0x230] ss:$8 sps:$4 sm:$0xff]   ;;  %v2555_v6 = vld [vmem:[#allocation5 + $0x244] ss:$8 sps:$4 sm:$0xff]  }
  0x61   :  { %1158 = vmatpush1.bf16.msra.mxu0 %v2510_v11  ;;  %v116_v5 = vld [vmem:[#allocation2 + $0x150] sm:$0xff]  ;;  %v125_v7 = vld [vmem:[#allocation2 + $0x198] sm:$0xff]  ;;  %v2627_v9 = vld [vmem:[#allocation5 + $0x60] ss:$8 sps:$4 sm:$0xff]  }
  0x62   :  { %1159 = vmatprep.subr.bf16.mxu0 %v2511_v12  ;;  %v133_v8 = vld [vmem:[#allocation2 + $0x1d8] sm:$0xff]  ;;  %v220_v10 = vpack.c.bf16 %v116_v5, %v108_v3  ;;  %v2553_v12 = vld [vmem:[#allocation5 + $0x240] ss:$8 sps:$4 sm:$0xff]   ;;  %v148_v32 = vld [vmem:[#allocation2 + $0x250] sm:$0xff] }
  0x63   :  { %1041 = vmatpush1.bf16.msra.mxu1 %v2609_v51  ;;  %v2631_v11 = vld [vmem:[#allocation5 + $0x74] ss:$8 sps:$4 sm:$0xff]   ;;  %v229_v13 = vpack.c.bf16 %v133_v8, %v125_v7  ;;  %v2556_v15 = vld [vmem:[#allocation5 + $0x250] ss:$8 sps:$4 sm:$0xff]   ;;  %v2649_v33 = vld [vmem:[#allocation5 + $0xa4] ss:$8 sps:$4 sm:$0xff]  }
  0x64   :  { %1042 = vmatprep.subr.bf16.mxu1 %v2613_v55  ;;  %v2558_v14 = vld [vmem:[#allocation5 + $0x254] ss:$8 sps:$4 sm:$0xff]   ;;  %v2651_v37 = vld [vmem:[#allocation5 + $0xa0] ss:$8 sps:$4 sm:$0xff]   ;;  %v2568_v43 = vld [vmem:[#allocation5 + $0x290] ss:$8 sps:$4 sm:$0xff]  }
  0x65   :  { %1160 = vmatpush1.bf16.msra.mxu0 %v2513_v16  ;;  %v124_v16 = vld [vmem:[#allocation2 + $0x190] sm:$0xff]  ;;  %v2565_v40 = vld [vmem:[#allocation5 + $0x280] ss:$8 sps:$4 sm:$0xff]   ;;  %v181_v50 = vld [vmem:[#allocation2 + $0x358] sm:$0xff] }
  0x66   :  { %1161 = vmatprep.subr.bf16.mxu0 %v2514_v17  ;;  %v2633_v17 = vld [vmem:[#allocation5 + $0x70] ss:$8 sps:$4 sm:$0xff]   ;;  %v2570_v42 = vld [vmem:[#allocation5 + $0x294] ss:$8 sps:$4 sm:$0xff]   ;;  %v2663_v51 = vld [vmem:[#allocation5 + $0xc0] ss:$8 sps:$4 sm:$0xff]  }
  0x67   :  { %1043 = vmatpush1.bf16.msra.mxu1 %v2615_v59  ;;  %v156_v44 = vld [vmem:[#allocation2 + $0x290] sm:$0xff]  ;;  %v2571_v54 = vld [vmem:[#allocation5 + $0x2a0] ss:$8 sps:$4 sm:$0xff]   ;;  %v2673_v59 = vld [vmem:[#allocation5 + $0xe4] ss:$8 sps:$4 sm:$0xff]  }
  0x68   :  { %1044 = vmatprep.subr.bf16.mxu1 %v2619_v63  ;;  %v2657_v45 = vld [vmem:[#allocation5 + $0xb0] ss:$8 sps:$4 sm:$0xff]   ;;  %v2667_v53 = vld [vmem:[#allocation5 + $0xd4] ss:$8 sps:$4 sm:$0xff]   ;;  %v83_v63 = vld [vmem:[#allocation2 + $0x48] sm:$0xff] }
  0x69   :  { %1162 = vmatpush1.bf16.msra.mxu0 %v2516_v18  ;;  %v132_v18 = vld [vmem:[#allocation2 + $0x1d0] sm:$0xff]  ;;  %v2577_v7 = vld [vmem:[#allocation5 + $0x2c0] ss:$8 sps:$4 sm:$0xff]  }
  0x6a   :  { %1163 = vmatprep.subr.bf16.mxu0 %v2517_v19  ;;  %v2637_v19 = vld [vmem:[#allocation5 + $0x84] ss:$8 sps:$4 sm:$0xff]   ;;  %v2669_v57 = vld [vmem:[#allocation5 + $0xd0] ss:$8 sps:$4 sm:$0xff]  }
  0x6b   :  { %1045 = vmatpush1.bf16.msra.mxu1 %v2621_v1  ;;  %v2574_v58 = vld [vmem:[#allocation5 + $0x2b0] ss:$8 sps:$4 sm:$0xff]  }
  0x6c   :  { %1046 = vmatprep.subr.bf16.mxu1 %v2625_v4  ;;  %v189_v1 = vld [vmem:[#allocation2 + $0x398] sm:$0xff]  ;;  %v2675_v4 = vld [vmem:[#allocation5 + $0xe0] ss:$8 sps:$4 sm:$0xff]  }
  0x6d   :  { %1164 = vmatpush1.bf16.msra.mxu0 %v2519_v20  ;;  %v2561_v20 = vld [vmem:[#allocation5 + $0x264] ss:$8 sps:$4 sm:$0xff]  }
  0x6e   :  { %1165 = vmatprep.subr.bf16.mxu0 %v2520_v21  ;;  %v141_v21 = vld [vmem:[#allocation2 + $0x218] sm:$0xff] }
  0x6f   :  { %1047 = vmatpush1.bf16.msra.mxu1 %v2627_v9  ;;  %v2582_v9 = vld [vmem:[#allocation5 + $0x2d4] ss:$8 sps:$4 sm:$0xff]  }
  0x70   :  { %1048 = vmatprep.subr.bf16.mxu1 %v2631_v11  ;;  %v74_v11 = vld [vmem:[#allocation2] sm:$0xff] }
  0x71   :  { %1166 = vmatpush1.bf16.msra.mxu0 %v2522_v22  ;;  %v149_v22 = vld [vmem:[#allocation2 + $0x258] sm:$0xff] }
  0x72   :  { %1167 = vmatprep.subr.bf16.mxu0 %v2523_v23  ;;  %v2639_v23 = vld [vmem:[#allocation5 + $0x80] ss:$8 sps:$4 sm:$0xff]  }
  0x73   :  { %1049 = vmatpush1.bf16.msra.mxu1 %v2633_v17  ;;  %v196_v17 = vld [vmem:[#allocation2 + $0x3d0] sm:$0xff] }
  0x74   :  { %1050 = vmatprep.subr.bf16.mxu1 %v2637_v19  ;;  %v79_v19 = vld [vmem:[#allocation2 + $0x28] sm:$0xff] }
  0x75   :  { %1168 = vmatpush1.bf16.msra.mxu0 %v2525_v24  ;;  %v228_v24 = vpack.c.bf16 %v132_v18, %v124_v16  ;;  %v188_v16 = vld [vmem:[#allocation2 + $0x390] sm:$0xff]  ;;  %v2585_v18 = vld [vmem:[#allocation5 + $0x2e4] ss:$8 sps:$4 sm:$0xff]  }
  0x76   :  { %1169 = vmatprep.subr.bf16.mxu0 %v2526_v25  ;;  %v2643_v25 = vld [vmem:[#allocation5 + $0x94] ss:$8 sps:$4 sm:$0xff]  }
  0x77   :  { %1051 = vmatpush1.bf16.msra.mxu1 %v2639_v23  ;;  %v260_v23 = vpack.c.bf16 %v196_v17, %v188_v16  ;;  %v2624_v17 = vld [vmem:[#allocation5 + $0x354] ss:$8 sps:$4 sm:$0xff]  }
  0x78   :  { %1052 = vmatprep.subr.bf16.mxu1 %v2643_v25 }
  0x79   :  { %1170 = vmatpush1.bf16.msra.mxu0 %v2528_v26  ;;  %v2559_v26 = vld [vmem:[#allocation5 + $0x260] ss:$8 sps:$4 sm:$0xff]  }
  0x7a   :  { %1171 = vmatprep.subr.bf16.mxu0 %v2529_v27  ;;  %v237_v27 = vpack.c.bf16 %v149_v22, %v141_v21 }
  0x7d   :  { %1172 = vmatpush1.bf16.msra.mxu0 %v2531_v28  ;;  %v2564_v28 = vld [vmem:[#allocation5 + $0x274] ss:$8 sps:$4 sm:$0xff]  }
  0x7e   :  { %1173 = vmatprep.subr.bf16.mxu0 %v2532_v29  ;;  %v2562_v29 = vld [vmem:[#allocation5 + $0x270] ss:$8 sps:$4 sm:$0xff]  }
  0x81   :  { %1174 = vmatpush1.bf16.msra.mxu0 %v2534_v30  ;;  %v140_v30 = vld [vmem:[#allocation2 + $0x210] sm:$0xff] }
  0x82   :  { %1175 = vmatprep.subr.bf16.mxu0 %v2535_v31  ;;  %v2645_v31 = vld [vmem:[#allocation5 + $0x90] ss:$8 sps:$4 sm:$0xff]   ;;  %v236_v38 = vpack.c.bf16 %v148_v32, %v140_v30  ;;  %v115_v30 = vld [vmem:[#allocation2 + $0x148] sm:$0xff]  ;;  %v78_v32 = vld [vmem:[#allocation2 + $0x20] sm:$0xff] }
  0x83   :  { %1053 = vmatpush1.bf16.msra.mxu1 %v2645_v31  ;;  %v2586_v31 = vld [vmem:[#allocation5 + $0x2f0] ss:$8 sps:$4 sm:$0xff]  }
  0x84   :  { %1054 = vmatprep.subr.bf16.mxu1 %v2649_v33  ;;  %v86_v33 = vld [vmem:[#allocation2 + $0x60] sm:$0xff] }
  0x85   :  { %1176 = vmatpush1.bf16.msra.mxu0 %v2537_v34  ;;  %v2567_v34 = vld [vmem:[#allocation5 + $0x284] ss:$8 sps:$4 sm:$0xff]  }
  0x86   :  { %1177 = vmatprep.subr.bf16.mxu0 %v2538_v35  ;;  %v157_v35 = vld [vmem:[#allocation2 + $0x298] sm:$0xff] }
  0x87   :  { %1055 = vmatpush1.bf16.msra.mxu1 %v2651_v37 }
  0x89   :  { %1178 = vmatpush1.bf16.msra.mxu0 %v2540_v36  ;;  %v165_v36 = vld [vmem:[#allocation2 + $0x2d8] sm:$0xff] }
  0x8a   :  { %1260 = vmatprep.subr.bf16.mxu0 %v2543_v39  ;;  %v2655_v39 = vld [vmem:[#allocation5 + $0xb4] ss:$8 sps:$4 sm:$0xff]   ;;  %v245_v41 = vpack.c.bf16 %v165_v36, %v157_v35  ;;  %v95_v35 = vld [vmem:[#allocation2 + $0xa8] sm:$0xff] }
  0x8b   :  { %1056 = vmatprep.subr.bf16.mxu1 %v2655_v39  ;;  %v103_v36 = vld [vmem:[#allocation2 + $0xe8] sm:$0xff]  ;;  %v206_v39 = vpack.c.bf16 %v86_v33, %v78_v32  ;;  %v2700_v32 = vld [vmem:[#allocation7 + $0x50] ss:$8 sps:$4 sm:$0xff]  }
  0x8c   :  { %1180 = vmatmul.mubr.bf16.vlgmr.msra.gmra.mrb[0].mxu0 %v204_v46  ;;  %v164_v46 = vld [vmem:[#allocation2 + $0x2d0] sm:$0xff]  ;;  %1057 = vmatpush1.bf16.msra.mxu1 %v2657_v45  ;;  %v123_v45 = vld [vmem:[#allocation2 + $0x188] sm:$0xff] }
  0x8d   :  { %1261 = vmatpush1.bf16.msra.mxu0 %v2541_v47  ;;  %1189 = vmatprep.mubr.bf16.mxu0 %v213_v49  ;;  %v2661_v47 = vld [vmem:[#allocation5 + $0xc4] ss:$8 sps:$4 sm:$0xff]   ;;  %v173_v49 = vld [vmem:[#allocation2 + $0x318] sm:$0xff] }
  0x8e   :  { %1262 = vmatprep.subr.bf16.mxu0 %v2546_v48  ;;  %v2573_v48 = vld [vmem:[#allocation5 + $0x2a4] ss:$8 sps:$4 sm:$0xff]   ;;  %1058 = vmatprep.subr.bf16.mxu1 %v2661_v47  ;;  %v253_v55 = vpack.c.bf16 %v181_v50, %v173_v49  ;;  %v2598_v47 = vld [vmem:[#allocation5 + $0x310] ss:$8 sps:$4 sm:$0xff]  }
  0x8f   :  { %v102_v49 = vld [vmem:[#allocation2 + $0xe0] sm:$0xff] }
  0x90   :  { %1059 = vmatpush1.bf16.msra.mxu1 %v2663_v51  ;;  %v2687_v50 = vld [vmem:[#allocation7 + $0x4] ss:$8 sps:$4 sm:$0xff]  }
  0x91   :  { %1263 = vmatpush1.bf16.msra.mxu0 %v2544_v52  ;;  %v244_v52 = vpack.c.bf16 %v164_v46, %v156_v44  ;;  %1060 = vmatprep.subr.bf16.mxu1 %v2667_v53  ;;  %v114_v44 = vld [vmem:[#allocation2 + $0x140] sm:$0xff]  ;;  %v131_v51 = vld [vmem:[#allocation2 + $0x1c8] sm:$0xff] }
  0x92   :  { %1264 = vmatprep.subr.bf16.mxu0 %v2549_v56  ;;  %v2576_v56 = vld [vmem:[#allocation5 + $0x2b4] ss:$8 sps:$4 sm:$0xff]   ;;  %v2685_v46 = vld [vmem:[#allocation7] ss:$8 sps:$4 sm:$0xff]   ;;  %v2606_v53 = vld [vmem:[#allocation5 + $0x324] ss:$8 sps:$4 sm:$0xff]  }
  0x94   :  { %1190 = vmatmul.mubr.bf16.gmra.mrb[4].mxu0 %v212_v60  ;;  %v75_v60 = vld [vmem:[#allocation2 + $0x8] sm:$0xff]  ;;  %1061 = vmatpush1.bf16.msra.mxu1 %v2669_v57 }
  0x95   :  { %1265 = vmatpush1.bf16.msra.mxu0 %v2547_v61  ;;  %1199 = vmatprep.mubr.bf16.mxu0 %v221_v62  ;;  %v172_v61 = vld [vmem:[#allocation2 + $0x310] sm:$0xff]  ;;  %v203_v3 = vpack.c.bf16 %v83_v63, %v75_v60  ;;  %v2604_v57 = vld [vmem:[#allocation5 + $0x320] ss:$8 sps:$4 sm:$0xff]  }
  0x96   :  { %1266 = vmatprep.subr.bf16.mxu0 %v2552_v0  ;;  %v180_v62 = vld [vmem:[#allocation2 + $0x350] sm:$0xff]  ;;  %v2579_v0 = vld [vmem:[#allocation5 + $0x2c4] ss:$8 sps:$4 sm:$0xff]   ;;  %1062 = vmatprep.subr.bf16.mxu1 %v2673_v59 }
  0x97   :  { %v252_v5 = vpack.c.bf16 %v180_v62, %v172_v61  ;;  %1066 = vmatprep.mubr.bf16.mxu1 %v203_v3  ;;  %v2688_v59 = vld [vmem:[#allocation7 + $0x10] ss:$8 sps:$4 sm:$0xff]   ;;  %v2612_v61 = vld [vmem:[#allocation5 + $0x334] ss:$8 sps:$4 sm:$0xff]   ;;  %v2693_v62 = vld [vmem:[#allocation7 + $0x24] ss:$8 sps:$4 sm:$0xff]  }
  0x98   :  { %1063 = vmatpush1.bf16.msra.mxu1 %v2675_v4  ;;  %v2610_v3 = vld [vmem:[#allocation5 + $0x330] ss:$8 sps:$4 sm:$0xff]   ;;  %v110_v4 = vld [vmem:[#allocation2 + $0x120] sm:$0xff] }
  0x99   :  { %1267 = vmatpush1.bf16.msra.mxu0 %v2550_v2  ;;  %v197_v2 = vld [vmem:[#allocation2 + $0x3d8] sm:$0xff] }
  0x9a   :  { %1268 = vmatprep.subr.bf16.mxu0 %v2555_v6  ;;  %v2679_v6 = vld [vmem:[#allocation5 + $0xf4] ss:$8 sps:$4 sm:$0xff]   ;;  %v261_v8 = vpack.c.bf16 %v197_v2, %v189_v1  ;;  %v130_v1 = vld [vmem:[#allocation2 + $0x1c0] sm:$0xff]  ;;  %v139_v2 = vld [vmem:[#allocation2 + $0x208] sm:$0xff] }
  0x9b   :  { %1064 = vmatprep.subr.bf16.mxu1 %v2679_v6  ;;  %v2691_v6 = vld [vmem:[#allocation7 + $0x20] ss:$8 sps:$4 sm:$0xff]  }
  0x9c   :  { %1200 = vmatmul.mubr.bf16.gmra.mrb[8].mxu0 %v220_v10  ;;  %v2681_v10 = vld [vmem:[#allocation5 + $0xf0] ss:$8 sps:$4 sm:$0xff]  }
  0x9d   :  { %1269 = vmatpush1.bf16.msra.mxu0 %v2553_v12  ;;  %1209 = vmatprep.mubr.bf16.mxu0 %v229_v13  ;;  %v82_v12 = vld [vmem:[#allocation2 + $0x40] sm:$0xff]  ;;  %v91_v13 = vld [vmem:[#allocation2 + $0x88] sm:$0xff] }
  0x9e   :  { %1270 = vmatprep.subr.bf16.mxu0 %v2558_v14  ;;  %v99_v14 = vld [vmem:[#allocation2 + $0xc8] sm:$0xff]  ;;  %v202_v21 = vpack.c.bf16 %v82_v12, %v74_v11  ;;  %1065 = vmatpush1.bf16.msra.mxu1 %v2681_v10 }
  0x9f   :  { %v211_v22 = vpack.c.bf16 %v99_v14, %v91_v13  ;;  %1726 = vmatprep.subr.bf16.mxu1 %v2687_v50  ;;  %v127_v10 = vld [vmem:[#allocation2 + $0x1a8] sm:$0xff] }
  0xa0   :  { %v135_v11 = vld [vmem:[#allocation2 + $0x1e8] sm:$0xff] }
  0xa1   :  { %1271 = vmatpush1.bf16.msra.mxu0 %v2556_v15  ;;  %v2580_v15 = vld [vmem:[#allocation5 + $0x2d0] ss:$8 sps:$4 sm:$0xff]   ;;  %1067 = vmatmul.mubr.bf16.vlgmr.msra.gmra.mrb[0].mxu1 %v202_v21  ;;  %v2616_v13 = vld [vmem:[#allocation5 + $0x340] ss:$8 sps:$4 sm:$0xff]  }
  0xa2   :  { %1272 = vmatprep.subr.bf16.mxu0 %v2561_v20  ;;  %v87_v20 = vld [vmem:[#allocation2 + $0x68] sm:$0xff]  ;;  %1076 = vmatprep.mubr.bf16.mxu1 %v211_v22  ;;  %v146_v21 = vld [vmem:[#allocation2 + $0x240] sm:$0xff] }
  0xa3   :  { %v207_v25 = vpack.c.bf16 %v87_v20, %v79_v19  ;;  %1727 = vmatpush1.bf16.msra.mxu1 %v2685_v46  ;;  %v231_v19 = vpack.c.bf16 %v135_v11, %v127_v10  ;;  %v138_v20 = vld [vmem:[#allocation2 + $0x200] sm:$0xff]  ;;  %v155_v22 = vld [vmem:[#allocation2 + $0x288] sm:$0xff]  ;;  %v2634_v46 = vld [vmem:[#allocation5 + $0x370] ss:$8 sps:$4 sm:$0xff]  }
  0xa4   :  { %1210 = vmatmul.mubr.bf16.gmra.mrb[12].mxu0 %v228_v24  ;;  %v2583_v24 = vld [vmem:[#allocation5 + $0x2e0] ss:$8 sps:$4 sm:$0xff]   ;;  %v234_v33 = vpack.c.bf16 %v146_v21, %v138_v20  ;;  %v2712_v10 = vld [vmem:[#allocation7 + $0x90] ss:$8 sps:$4 sm:$0xff]  }
  0xa5   :  { %1273 = vmatpush1.bf16.msra.mxu0 %v2559_v26  ;;  %1219 = vmatprep.mubr.bf16.mxu0 %v237_v27  ;;  %v2588_v26 = vld [vmem:[#allocation5 + $0x2f4] ss:$8 sps:$4 sm:$0xff]   ;;  %v90_v27 = vld [vmem:[#allocation2 + $0x80] sm:$0xff]  ;;  %v159_v50 = vld [vmem:[#allocation2 + $0x2a8] sm:$0xff] }
  0xa6   :  { %1274 = vmatprep.subr.bf16.mxu0 %v2564_v28  ;;  %v98_v28 = vld [vmem:[#allocation2 + $0xc0] sm:$0xff]  ;;  %v2658_v20 = vld [vmem:[#allocation5 + $0x3b0] ss:$8 sps:$4 sm:$0xff]  }
  0xa7   :  { %v210_v37 = vpack.c.bf16 %v98_v28, %v90_v27  ;;  %v134_v27 = vld [vmem:[#allocation2 + $0x1e0] sm:$0xff]  ;;  %v2702_v28 = vld [vmem:[#allocation7 + $0x54] ss:$8 sps:$4 sm:$0xff]  }
  0xa8   :  { %v174_v21 = vld [vmem:[#allocation2 + $0x320] sm:$0xff] }
  0xa9   :  { %1275 = vmatpush1.bf16.msra.mxu0 %v2562_v29  ;;  %v107_v29 = vld [vmem:[#allocation2 + $0x108] sm:$0xff]  ;;  %1077 = vmatmul.mubr.bf16.gmra.mrb[4].mxu1 %v210_v37 }
  0xaa   :  { %1276 = vmatprep.subr.bf16.mxu0 %v2567_v34  ;;  %v2594_v34 = vld [vmem:[#allocation5 + $0x304] ss:$8 sps:$4 sm:$0xff]  }
  0xac   :  { %1220 = vmatmul.mubr.bf16.gmra.mrb[16].mxu0 %v236_v38  ;;  %v219_v38 = vpack.c.bf16 %v115_v30, %v107_v29  ;;  %v2630_v29 = vld [vmem:[#allocation5 + $0x364] ss:$8 sps:$4 sm:$0xff]  }
  0xad   :  { %1277 = vmatpush1.bf16.msra.mxu0 %v2565_v40  ;;  %1229 = vmatprep.mubr.bf16.mxu0 %v245_v41  ;;  %v2592_v40 = vld [vmem:[#allocation5 + $0x300] ss:$8 sps:$4 sm:$0xff]   ;;  %v2600_v41 = vld [vmem:[#allocation5 + $0x314] ss:$8 sps:$4 sm:$0xff]  }
  0xae   :  { %1278 = vmatprep.subr.bf16.mxu0 %v2570_v42  ;;  %v215_v42 = vpack.c.bf16 %v103_v36, %v95_v35  ;;  %1086 = vmatprep.mubr.bf16.mxu1 %v219_v38  ;;  %v143_v30 = vld [vmem:[#allocation2 + $0x228] sm:$0xff]  ;;  %v2636_v38 = vld [vmem:[#allocation5 + $0x374] ss:$8 sps:$4 sm:$0xff]  }
  0xaf   :  { %v2628_v35 = vld [vmem:[#allocation5 + $0x360] ss:$8 sps:$4 sm:$0xff]  }
  0xb1   :  { %1279 = vmatpush1.bf16.msra.mxu0 %v2568_v43  ;;  %v106_v43 = vld [vmem:[#allocation2 + $0x100] sm:$0xff] }
  0xb2   :  { %1280 = vmatprep.subr.bf16.mxu0 %v2573_v48  ;;  %v94_v48 = vld [vmem:[#allocation2 + $0xa0] sm:$0xff] }
  0xb3   :  { %v214_v60 = vpack.c.bf16 %v102_v49, %v94_v48  ;;  %v150_v48 = vld [vmem:[#allocation2 + $0x260] sm:$0xff] }
  0xb4   :  { %1230 = vmatmul.mubr.bf16.gmra.mrb[20].mxu0 %v244_v52  ;;  %v2690_v52 = vld [vmem:[#allocation7 + $0x14] ss:$8 sps:$4 sm:$0xff]   ;;  %v2642_v49 = vld [vmem:[#allocation5 + $0x384] ss:$8 sps:$4 sm:$0xff]  }
  0xb5   :  { %1281 = vmatpush1.bf16.msra.mxu0 %v2571_v54  ;;  %1239 = vmatprep.mubr.bf16.mxu0 %v253_v55  ;;  %v111_v54 = vld [vmem:[#allocation2 + $0x128] sm:$0xff] }
  0xb6   :  { %1282 = vmatprep.subr.bf16.mxu0 %v2576_v56  ;;  %v119_v55 = vld [vmem:[#allocation2 + $0x168] sm:$0xff]  ;;  %v218_v56 = vpack.c.bf16 %v114_v44, %v106_v43  ;;  %1728 = vmatprep.subr.bf16.mxu1 %v2690_v52  ;;  %v2706_v52 = vld [vmem:[#allocation7 + $0x70] ss:$8 sps:$4 sm:$0xff]  }
  0xb7   :  { %v223_v63 = vpack.c.bf16 %v119_v55, %v111_v54  ;;  %1729 = vmatpush1.bf16.msra.mxu1 %v2688_v59  ;;  %v171_v43 = vld [vmem:[#allocation2 + $0x308] sm:$0xff]  ;;  %v2648_v59 = vld [vmem:[#allocation5 + $0x394] ss:$8 sps:$4 sm:$0xff]  }
  0xb8   :  { %1087 = vmatmul.mubr.bf16.gmra.mrb[8].mxu1 %v218_v56  ;;  %1730 = vmatprep.subr.bf16.mxu1 %v2693_v62  ;;  %v179_v44 = vld [vmem:[#allocation2 + $0x348] sm:$0xff] }
  0xb9   :  { %1283 = vmatpush1.bf16.msra.mxu0 %v2574_v58  ;;  %v227_v58 = vpack.c.bf16 %v131_v51, %v123_v45  ;;  %v2708_v45 = vld [vmem:[#allocation7 + $0x74] ss:$8 sps:$4 sm:$0xff]   ;;  %v167_v51 = vld [vmem:[#allocation2 + $0x2e8] sm:$0xff]  ;;  %v251_v54 = vpack.c.bf16 %v179_v44, %v171_v43  ;;  %v2682_v44 = vld [vmem:[#allocation5 + $0x3f0] ss:$8 sps:$4 sm:$0xff]  }
  0xba   :  { %1284 = vmatprep.subr.bf16.mxu0 %v2579_v0  ;;  %v122_v0 = vld [vmem:[#allocation2 + $0x180] sm:$0xff]  ;;  %v2684_v43 = vld [vmem:[#allocation5 + $0x3f4] ss:$8 sps:$4 sm:$0xff]  }
  0xbb   :  { %1096 = vmatprep.mubr.bf16.mxu1 %v227_v58  ;;  %v226_v12 = vpack.c.bf16 %v130_v1, %v122_v0  ;;  %1731 = vmatpush1.bf16.msra.mxu1 %v2691_v6  ;;  %v2711_v56 = vld [vmem:[#allocation7 + $0x84] ss:$8 sps:$4 sm:$0xff]   ;;  %v247_v58 = vpack.c.bf16 %v167_v51, %v159_v50  ;;  %v2709_v62 = vld [vmem:[#allocation7 + $0x80] ss:$8 sps:$4 sm:$0xff]   ;;  %v2714_v1 = vld [vmem:[#allocation7 + $0x94] ss:$8 sps:$4 sm:$0xff]  }
  0xbc   :  { %1240 = vmatmul.mubr.bf16.gmra.mrb[24].mxu0 %v252_v5  ;;  %v118_v5 = vld [vmem:[#allocation2 + $0x160] sm:$0xff]  ;;  %v195_v0 = vld [vmem:[#allocation2 + $0x3c8] sm:$0xff]  ;;  %v96_v51 = vld [vmem:[#allocation2 + $0xb0] sm:$0xff] }
  0xbd   :  { %1285 = vmatpush1.bf16.msra.mxu0 %v2577_v7  ;;  %1249 = vmatprep.mubr.bf16.mxu0 %v261_v8  ;;  %v147_v7 = vld [vmem:[#allocation2 + $0x248] sm:$0xff]  ;;  %v2696_v8 = vld [vmem:[#allocation7 + $0x34] ss:$8 sps:$4 sm:$0xff]   ;;  %v222_v16 = vpack.c.bf16 %v118_v5, %v110_v4  ;;  %v166_v4 = vld [vmem:[#allocation2 + $0x2e0] sm:$0xff] }
  0xbe   :  { %1286 = vmatprep.subr.bf16.mxu0 %v2582_v9  ;;  %v2618_v9 = vld [vmem:[#allocation5 + $0x344] ss:$8 sps:$4 sm:$0xff]   ;;  %v235_v14 = vpack.c.bf16 %v147_v7, %v139_v2  ;;  %1732 = vmatprep.subr.bf16.mxu1 %v2696_v8  ;;  %v2646_v2 = vld [vmem:[#allocation5 + $0x390] ss:$8 sps:$4 sm:$0xff]  }
  0xbf   :  { %v2654_v5 = vld [vmem:[#allocation5 + $0x3a4] ss:$8 sps:$4 sm:$0xff]  }
  0xc0   :  { %1097 = vmatmul.mubr.bf16.gmra.mrb[12].mxu1 %v226_v12  ;;  %v175_v6 = vld [vmem:[#allocation2 + $0x328] sm:$0xff] }
  0xc1   :  { %1287 = vmatpush1.bf16.msra.mxu0 %v2580_v15  ;;  %v2694_v15 = vld [vmem:[#allocation7 + $0x30] ss:$8 sps:$4 sm:$0xff]   ;;  %1106 = vmatprep.mubr.bf16.mxu1 %v235_v14  ;;  %v183_v7 = vld [vmem:[#allocation2 + $0x368] sm:$0xff] }
  0xc2   :  { %1288 = vmatprep.subr.bf16.mxu0 %v2585_v18  ;;  %v2699_v18 = vld [vmem:[#allocation7 + $0x44] ss:$8 sps:$4 sm:$0xff]   ;;  %1733 = vmatpush1.bf16.msra.mxu1 %v2694_v15  ;;  %v255_v14 = vpack.c.bf16 %v183_v7, %v175_v6  ;;  %v2660_v15 = vld [vmem:[#allocation5 + $0x3b4] ss:$8 sps:$4 sm:$0xff]  }
  0xc3   :  { %1734 = vmatprep.subr.bf16.mxu1 %v2699_v18  ;;  %v2717_v12 = vld [vmem:[#allocation7 + $0xa4] ss:$8 sps:$4 sm:$0xff]   ;;  %v2715_v18 = vld [vmem:[#allocation7 + $0xa0] ss:$8 sps:$4 sm:$0xff]   ;;  %v144_v7 = vld [vmem:[#allocation2 + $0x230] sm:$0xff] }
  0xc4   :  { %1250 = vmatmul.mubr.bf16.gmra.mrb[28].mxu0 %v260_v23  ;;  %v163_v23 = vld [vmem:[#allocation2 + $0x2c8] sm:$0xff] }
  0xc5   :  { %1289 = vmatpush1.bf16.msra.mxu0 %v2583_v24  ;;  %1292 = vmatprep.mubr.bf16.mxu0 %v207_v25  ;;  %v2697_v24 = vld [vmem:[#allocation7 + $0x40] ss:$8 sps:$4 sm:$0xff]   ;;  %v2622_v25 = vld [vmem:[#allocation5 + $0x350] ss:$8 sps:$4 sm:$0xff]   ;;  %v243_v36 = vpack.c.bf16 %v163_v23, %v155_v22  ;;  %v2666_v23 = vld [vmem:[#allocation5 + $0x3c4] ss:$8 sps:$4 sm:$0xff]  }
  0xc6   :  { %1290 = vmatprep.subr.bf16.mxu0 %v2588_v26  ;;  %v126_v26 = vld [vmem:[#allocation2 + $0x1a0] sm:$0xff]  ;;  %1735 = vmatpush1.bf16.msra.mxu1 %v2697_v24  ;;  %v191_v24 = vld [vmem:[#allocation2 + $0x3a8] sm:$0xff] }
  0xc7   :  { %v230_v37 = vpack.c.bf16 %v134_v27, %v126_v26  ;;  %1736 = vmatprep.subr.bf16.mxu1 %v2702_v28  ;;  %v182_v22 = vld [vmem:[#allocation2 + $0x360] sm:$0xff]  ;;  %v2718_v27 = vld [vmem:[#allocation7 + $0xb0] ss:$8 sps:$4 sm:$0xff]  }
  0xc8   :  { %1107 = vmatmul.mubr.bf16.gmra.mrb[16].mxu1 %v234_v33  ;;  %v254_v28 = vpack.c.bf16 %v182_v22, %v174_v21  ;;  %v2721_v33 = vld [vmem:[#allocation7 + $0xc0] ss:$8 sps:$4 sm:$0xff]   ;;  %v193_v21 = vld [vmem:[#allocation2 + $0x3b8] sm:$0xff] }
  0xc9   :  { %1291 = vmatpush1.bf16.msra.mxu0 %v2586_v31  ;;  %v151_v31 = vld [vmem:[#allocation2 + $0x268] sm:$0xff]  ;;  %1116 = vmatprep.mubr.bf16.mxu1 %v243_v36  ;;  %v198_v36 = vld [vmem:[#allocation2 + $0x3e0] sm:$0xff]  ;;  %v201_v22 = vld [vmem:[#allocation2 + $0x3f8] sm:$0xff] }
  0xca   :  { %1373 = vmatprep.subr.bf16.mxu0 %v2594_v34  ;;  %v2705_v34 = vld [vmem:[#allocation7 + $0x64] ss:$8 sps:$4 sm:$0xff]   ;;  %1737 = vmatpush1.bf16.msra.mxu1 %v2700_v32  ;;  %v2672_v32 = vld [vmem:[#allocation5 + $0x3d4] ss:$8 sps:$4 sm:$0xff]  }
  0xcb   :  { %1738 = vmatprep.subr.bf16.mxu1 %v2705_v34  ;;  %v2670_v34 = vld [vmem:[#allocation5 + $0x3d0] ss:$8 sps:$4 sm:$0xff]  }
  0xcc   :  { %1293 = vmatmul.mubr.bf16.vlgmr.msra.gmra.mrb[0].mxu0 %v206_v39  ;;  %v239_v39 = vpack.c.bf16 %v151_v31, %v143_v30  ;;  %v2664_v30 = vld [vmem:[#allocation5 + $0x3c0] ss:$8 sps:$4 sm:$0xff]  }
  0xcd   :  { %1374 = vmatpush1.bf16.msra.mxu0 %v2592_v40  ;;  %1302 = vmatprep.mubr.bf16.mxu0 %v215_v42  ;;  %v154_v40 = vld [vmem:[#allocation2 + $0x280] sm:$0xff] }
  0xce   :  { %1375 = vmatprep.subr.bf16.mxu0 %v2600_v41  ;;  %v162_v41 = vld [vmem:[#allocation2 + $0x2c0] sm:$0xff] }
  0xcf   :  { %v2703_v42 = vld [vmem:[#allocation7 + $0x60] ss:$8 sps:$4 sm:$0xff]  }
  0xd0   :  { %1739 = vmatpush1.bf16.msra.mxu1 %v2703_v42 }
  0xd1   :  { %1376 = vmatpush1.bf16.msra.mxu0 %v2598_v47  ;;  %v142_v47 = vld [vmem:[#allocation2 + $0x220] sm:$0xff]  ;;  %1740 = vmatprep.subr.bf16.mxu1 %v2708_v45  ;;  %v80_v45 = vld [vmem:[#allocation2 + $0x30] sm:$0xff] }
  0xd2   :  { %1377 = vmatprep.subr.bf16.mxu0 %v2606_v53  ;;  %v242_v53 = vpack.c.bf16 %v162_v41, %v154_v40  ;;  %v238_v55 = vpack.c.bf16 %v150_v48, %v142_v47  ;;  %v2676_v41 = vld [vmem:[#allocation5 + $0x3e0] ss:$8 sps:$4 sm:$0xff]   ;;  %v97_v47 = vld [vmem:[#allocation2 + $0xb8] sm:$0xff] }
  0xd3   :  { %v105_v48 = vld [vmem:[#allocation2 + $0xf8] sm:$0xff] }
  0xd4   :  { %1303 = vmatmul.mubr.bf16.gmra.mrb[4].mxu0 %v214_v60  ;;  %1117 = vmatmul.mubr.bf16.gmra.mrb[20].mxu1 %v242_v53  ;;  %v170_v60 = vld [vmem:[#allocation2 + $0x300] sm:$0xff]  ;;  %v217_v50 = vpack.c.bf16 %v105_v48, %v97_v47  ;;  %v113_v53 = vld [vmem:[#allocation2 + $0x138] sm:$0xff] }
  0xd5   :  { %1378 = vmatpush1.bf16.msra.mxu0 %v2604_v57  ;;  %1312 = vmatprep.mubr.bf16.mxu0 %v223_v63  ;;  %v2640_v57 = vld [vmem:[#allocation5 + $0x380] ss:$8 sps:$4 sm:$0xff]  }
  0xd6   :  { %1379 = vmatprep.subr.bf16.mxu0 %v2612_v61  ;;  %1126 = vmatprep.mubr.bf16.mxu1 %v251_v54  ;;  %v178_v61 = vld [vmem:[#allocation2 + $0x340] sm:$0xff]  ;;  %v187_v63 = vld [vmem:[#allocation2 + $0x388] sm:$0xff]  ;;  %v121_v54 = vld [vmem:[#allocation2 + $0x178] sm:$0xff] }
  0xd7   :  { %1741 = vmatpush1.bf16.msra.mxu1 %v2706_v52  ;;  %v250_v8 = vpack.c.bf16 %v178_v61, %v170_v60  ;;  %v104_v52 = vld [vmem:[#allocation2 + $0xf0] sm:$0xff]  ;;  %v137_v60 = vld [vmem:[#allocation2 + $0x1f8] sm:$0xff] }
  0xd8   :  { %1742 = vmatprep.subr.bf16.mxu1 %v2711_v56  ;;  %v225_v56 = vpack.c.bf16 %v121_v54, %v113_v53  ;;  %v2724_v61 = vld [vmem:[#allocation7 + $0xd0] ss:$8 sps:$4 sm:$0xff]  }
  0xd9   :  { %1380 = vmatpush1.bf16.msra.mxu0 %v2610_v3  ;;  %v158_v3 = vld [vmem:[#allocation2 + $0x2a0] sm:$0xff] }
  0xda   :  { %1381 = vmatprep.subr.bf16.mxu0 %v2618_v9  ;;  %v259_v9 = vpack.c.bf16 %v195_v0, %v187_v63  ;;  %v246_v11 = vpack.c.bf16 %v166_v4, %v158_v3  ;;  %v145_v3 = vld [vmem:[#allocation2 + $0x238] sm:$0xff] }
  0xdb   :  { %1743 = vmatpush1.bf16.msra.mxu1 %v2709_v62  ;;  %v2726_v62 = vld [vmem:[#allocation7 + $0xd4] ss:$8 sps:$4 sm:$0xff]  }
  0xdc   :  { %1313 = vmatmul.mubr.bf16.gmra.mrb[8].mxu0 %v222_v16  ;;  %1744 = vmatprep.subr.bf16.mxu1 %v2714_v1  ;;  %v186_v16 = vld [vmem:[#allocation2 + $0x380] sm:$0xff]  ;;  %v128_v1 = vld [vmem:[#allocation2 + $0x1b0] sm:$0xff]  ;;  %v153_v4 = vld [vmem:[#allocation2 + $0x278] sm:$0xff] }
  0xdd   :  { %1382 = vmatpush1.bf16.msra.mxu0 %v2616_v13  ;;  %1322 = vmatprep.mubr.bf16.mxu0 %v231_v19  ;;  %v2652_v13 = vld [vmem:[#allocation5 + $0x3a0] ss:$8 sps:$4 sm:$0xff]   ;;  %v2720_v19 = vld [vmem:[#allocation7 + $0xb4] ss:$8 sps:$4 sm:$0xff]   ;;  %v241_v6 = vpack.c.bf16 %v153_v4, %v145_v3 }
  0xde   :  { %1383 = vmatprep.subr.bf16.mxu0 %v2624_v17  ;;  %1127 = vmatmul.mubr.bf16.gmra.mrb[24].mxu1 %v250_v8  ;;  %v194_v17 = vld [vmem:[#allocation2 + $0x3c0] sm:$0xff]  ;;  %v152_v8 = vld [vmem:[#allocation2 + $0x270] sm:$0xff] }
  0xdf   :  { %1136 = vmatprep.mubr.bf16.mxu1 %v259_v9  ;;  %1745 = vmatpush1.bf16.msra.mxu1 %v2712_v10  ;;  %v258_v26 = vpack.c.bf16 %v194_v17, %v186_v16  ;;  %v161_v9 = vld [vmem:[#allocation2 + $0x2b8] sm:$0xff] }
  0xe0   :  { %1746 = vmatprep.subr.bf16.mxu1 %v2717_v12  ;;  %v169_v10 = vld [vmem:[#allocation2 + $0x2f8] sm:$0xff] }
  0xe1   :  { %1384 = vmatpush1.bf16.msra.mxu0 %v2622_v25  ;;  %v199_v25 = vld [vmem:[#allocation2 + $0x3e8] sm:$0xff]  ;;  %v249_v12 = vpack.c.bf16 %v169_v10, %v161_v9  ;;  %v185_v16 = vld [vmem:[#allocation2 + $0x378] sm:$0xff] }
  0xe2   :  { %1385 = vmatprep.subr.bf16.mxu0 %v2630_v29  ;;  %v2723_v29 = vld [vmem:[#allocation7 + $0xc4] ss:$8 sps:$4 sm:$0xff]   ;;  %v263_v31 = vpack.c.bf16 %v199_v25, %v191_v24  ;;  %v265_v24 = vpack.c.bf16 %v201_v22, %v193_v21  ;;  %v192_v25 = vld [vmem:[#allocation2 + $0x3b0] sm:$0xff] }
  0xe3   :  { %1747 = vmatpush1.bf16.msra.mxu1 %v2715_v18 }
  0xe4   :  { %1323 = vmatmul.mubr.bf16.gmra.mrb[12].mxu0 %v230_v37  ;;  %1748 = vmatprep.subr.bf16.mxu1 %v2720_v19  ;;  %v2678_v37 = vld [vmem:[#allocation5 + $0x3e4] ss:$8 sps:$4 sm:$0xff]   ;;  %v176_v19 = vld [vmem:[#allocation2 + $0x330] sm:$0xff] }
  0xe5   :  { %1386 = vmatpush1.bf16.msra.mxu0 %v2628_v35  ;;  %1332 = vmatprep.mubr.bf16.mxu0 %v239_v39  ;;  %v190_v35 = vld [vmem:[#allocation2 + $0x3a0] sm:$0xff]  ;;  %v89_v39 = vld [vmem:[#allocation2 + $0x78] sm:$0xff] }
  0xe6   :  { %1387 = vmatprep.subr.bf16.mxu0 %v2636_v38  ;;  %1137 = vmatmul.mubr.bf16.gmra.mrb[28].mxu1 %v258_v26  ;;  %v81_v38 = vld [vmem:[#allocation2 + $0x38] sm:$0xff]  ;;  %v262_v40 = vpack.c.bf16 %v198_v36, %v190_v35  ;;  %v200_v26 = vld [vmem:[#allocation2 + $0x3f0] sm:$0xff] }
  0xe7   :  { %1749 = vmatpush1.bf16.msra.mxu1 %v2718_v27  ;;  %v209_v42 = vpack.c.bf16 %v89_v39, %v81_v38  ;;  %v264_v27 = vpack.c.bf16 %v200_v26, %v192_v25  ;;  %v2736_v25 = vld [vmem:[#allocation8 + $0x8] sm:$0xff]  }
  0xe8   :  { %1750 = vmatprep.subr.bf16.mxu1 %v2723_v29  ;;  %v2727_v29 = vld [vmem:[#allocation7 + $0xe0] ss:$8 sps:$4 sm:$0xff]  }
  0xe9   :  { %1388 = vmatpush1.bf16.msra.mxu0 %v2634_v46  ;;  %v88_v46 = vld [vmem:[#allocation2 + $0x70] sm:$0xff] }
  0xea   :  { %1389 = vmatprep.subr.bf16.mxu0 %v2642_v49  ;;  %v208_v49 = vpack.c.bf16 %v88_v46, %v80_v45 }
  0xeb   :  { %1751 = vmatpush1.bf16.msra.mxu1 %v2721_v33 }
  0xec   :  { %1333 = vmatmul.mubr.bf16.gmra.mrb[16].mxu0 %v238_v55  ;;  %v216_v55 = vpack.c.bf16 %v104_v52, %v96_v51  ;;  %1752 = vmatprep.subr.bf16.mxu1 %v2726_v62 }
  0xed   :  { %1390 = vmatpush1.bf16.msra.mxu0 %v2640_v57  ;;  %1342 = vmatprep.mubr.bf16.mxu0 %v247_v58  ;;  %v112_v57 = vld [vmem:[#allocation2 + $0x130] sm:$0xff] }
  0xee   :  { %1391 = vmatprep.subr.bf16.mxu0 %v2648_v59  ;;  %v120_v58 = vld [vmem:[#allocation2 + $0x170] sm:$0xff]  ;;  %v129_v59 = vld [vmem:[#allocation2 + $0x1b8] sm:$0xff] }
  0xef   :  { %v224_v63 = vpack.c.bf16 %v120_v58, %v112_v57  ;;  %v233_v0 = vpack.c.bf16 %v137_v60, %v129_v59  ;;  %1753 = vmatpush1.bf16.msra.mxu1 %v2724_v61 }
  0xf1   :  { %1392 = vmatpush1.bf16.msra.mxu0 %v2646_v2  ;;  %v136_v2 = vld [vmem:[#allocation2 + $0x1f0] sm:$0xff] }
  0xf2   :  { %1393 = vmatprep.subr.bf16.mxu0 %v2654_v5  ;;  %v232_v5 = vpack.c.bf16 %v136_v2, %v128_v1 }
  0xf4   :  { %1343 = vmatmul.mubr.bf16.gmra.mrb[20].mxu0 %v246_v11  ;;  %v240_v11 = vpack.c.bf16 %v152_v8, %v144_v7 }
  0xf5   :  { %1394 = vmatpush1.bf16.msra.mxu0 %v2652_v13  ;;  %1352 = vmatprep.mubr.bf16.mxu0 %v255_v14  ;;  %v160_v13 = vld [vmem:[#allocation2 + $0x2b0] sm:$0xff] }
  0xf6   :  { %1395 = vmatprep.subr.bf16.mxu0 %v2660_v15  ;;  %v168_v14 = vld [vmem:[#allocation2 + $0x2f0] sm:$0xff]  ;;  %v177_v15 = vld [vmem:[#allocation2 + $0x338] sm:$0xff] }
  0xf7   :  { %v248_v17 = vpack.c.bf16 %v168_v14, %v160_v13  ;;  %v257_v18 = vpack.c.bf16 %v185_v16, %v177_v15  ;;  %v2734_v16 = vld [vmem:[#allocation8] sm:$0xff]  }
  0xf9   :  { %1396 = vmatpush1.bf16.msra.mxu0 %v2658_v20  ;;  %v184_v20 = vld [vmem:[#allocation2 + $0x370] sm:$0xff] }
  0xfa   :  { %1397 = vmatprep.subr.bf16.mxu0 %v2666_v23  ;;  %v256_v23 = vpack.c.bf16 %v184_v20, %v176_v19  ;;  %v2735_v19 = vld [vmem:[#allocation8 + $0x48] sm:$0xff]  }
  0xfc   :  { %1353 = vmatmul.mubr.bf16.gmra.mrb[24].mxu0 %v254_v28  ;;  %v2729_v28 = vld [vmem:[#allocation7 + $0xe4] ss:$8 sps:$4 sm:$0xff]  }
  0xfd   :  { %1398 = vmatpush1.bf16.msra.mxu0 %v2664_v30  ;;  %1362 = vmatprep.mubr.bf16.mxu0 %v263_v31  ;;  %v2732_v30 = vld [vmem:[#allocation7 + $0xf4] ss:$8 sps:$4 sm:$0xff]   ;;  %v2730_v31 = vld [vmem:[#allocation7 + $0xf0] ss:$8 sps:$4 sm:$0xff]  }
  0xfe   :  { %1399 = vmatprep.subr.bf16.mxu0 %v2672_v32  ;;  %1754 = vmatprep.subr.bf16.mxu1 %v2729_v28  ;;  %v2737_v28 = vld [vmem:[#allocation8 + $0x50] sm:$0xff]  }
  0xff   :  { %1755 = vmatpush1.bf16.msra.mxu1 %v2727_v29 }
 0x100   :  { %1756 = vmatprep.subr.bf16.mxu1 %v2732_v30 }
 0x101   :  { %1400 = vmatpush1.bf16.msra.mxu0 %v2670_v34 }
 0x102   :  { %1401 = vmatprep.subr.bf16.mxu0 %v2678_v37 }
 0x103   :  { %1757 = vmatpush1.bf16.msra.mxu1 %v2730_v31 }
 0x104   :  { %1363 = vmatmul.mubr.bf16.gmra.mrb[28].mxu0 %v262_v40  ;;  %v2733_v40 = vld [vmem:[#allocation8 + $0x40] sm:$0xff]  }
 0x105   :  { %1402 = vmatpush1.bf16.msra.mxu0 %v2676_v41  ;;  %1405 = vmatprep.mubr.bf16.mxu0 %v209_v42 }
 0x106   :  { %1403 = vmatprep.subr.bf16.mxu0 %v2684_v43  ;;  %2323 = vmatprep.subr.bf16.mxu1 %v2733_v40 }
 0x109   :  { %1404 = vmatpush1.bf16.msra.mxu0 %v2682_v44 }
 0x10c   :  { %1406 = vmatmul.mubr.bf16.vlgmr.msra.gmra.mrb[0].mxu0 %v208_v49 }
 0x10d   :  { %1415 = vmatprep.mubr.bf16.mxu0 %v217_v50 }
 0x114   :  { %1416 = vmatmul.mubr.bf16.gmra.mrb[4].mxu0 %v216_v55 }
 0x115   :  { %1425 = vmatprep.mubr.bf16.mxu0 %v225_v56 }
 0x11c   :  { %1426 = vmatmul.mubr.bf16.gmra.mrb[8].mxu0 %v224_v63 }
 0x11d   :  { %1435 = vmatprep.mubr.bf16.mxu0 %v233_v0 }
 0x124   :  { %1436 = vmatmul.mubr.bf16.gmra.mrb[12].mxu0 %v232_v5 }
 0x125   :  { %1445 = vmatprep.mubr.bf16.mxu0 %v241_v6 }
 0x12c   :  { %1446 = vmatmul.mubr.bf16.gmra.mrb[16].mxu0 %v240_v11 }
 0x12d   :  { %1455 = vmatprep.mubr.bf16.mxu0 %v249_v12 }
 0x134   :  { %1456 = vmatmul.mubr.bf16.gmra.mrb[20].mxu0 %v248_v17 }
 0x135   :  { %1465 = vmatprep.mubr.bf16.mxu0 %v257_v18 }
 0x13c   :  { %1466 = vmatmul.mubr.bf16.gmra.mrb[24].mxu0 %v256_v23 }
 0x13d   :  { %1475 = vmatprep.mubr.bf16.mxu0 %v265_v24 }
 0x144   :  { %1476 = vmatmul.mubr.bf16.gmra.mrb[28].mxu0 %v264_v27 }
 0x174   :  { %v1068_v32 = vpop.f32.mrb[0].mxu1 }
 0x175   :  { %v1070_v33 = vpop.f32.mrb[1].mxu1 }
 0x176   :  { %v1072_v34 = vpop.f32.mrb[2].mxu1 }
 0x177   :  { %v1074_v35 = vpop.f32.mrb[3].mxu1 }
 0x17c   :  { %v1078_v36 = vpop.f32.mrb[4].mxu1 }
 0x17d   :  { %v1080_v37 = vpop.f32.mrb[5].mxu1 }
 0x17e   :  { %v1082_v38 = vpop.f32.mrb[6].mxu1 }
 0x17f   :  { %v1084_v39 = vpop.f32.mrb[7].mxu1 }
 0x18b   :  { %v2966_v41 = vpop.f32.mrb[8].mxu1 }
 0x18c   :  { %v2968_v42 = vpop.f32.mrb[9].mxu1 }
 0x18d   :  { %v2970_v43 = vpop.f32.mrb[10].mxu1 }
 0x18e   :  { %v2972_v44 = vpop.f32.mrb[11].mxu1 }
 0x193   :  { %v2974_v45 = vpop.f32.mrb[12].mxu1 }
 0x194   :  { %v2976_v46 = vpop.f32.mrb[13].mxu1 }
 0x195   :  { %v2978_v47 = vpop.f32.mrb[14].mxu1 }
 0x196   :  { %v2980_v48 = vpop.f32.mrb[15].mxu1 }
 0x19b   :  { %v2982_v49 = vpop.f32.mrb[16].mxu1 }
 0x19c   :  { %v2984_v50 = vpop.f32.mrb[17].mxu1 }
 0x19d   :  { %v2986_v51 = vpop.f32.mrb[18].mxu1 }
 0x19e   :  { %v2988_v52 = vpop.f32.mrb[19].mxu1 }
 0x1a7   :  { %v2990_v53 = vpop.f32.mrb[20].mxu1 }
 0x1a8   :  { %v2992_v54 = vpop.f32.mrb[21].mxu1 }
 0x1a9   :  { %v2994_v55 = vpop.f32.mrb[22].mxu1 }
 0x1aa   :  { %v2996_v56 = vpop.f32.mrb[23].mxu1 }
 0x1b1   :  { %v2998_v57 = vpop.f32.mrb[24].mxu1 }
 0x1b2   :  { %v3000_v58 = vpop.f32.mrb[25].mxu1 }
 0x1b3   :  { %v3002_v59 = vpop.f32.mrb[26].mxu1 }
 0x1b4   :  { %v3004_v60 = vpop.f32.mrb[27].mxu1 }
 0x1b9   :  { %v3006_v61 = vpop.f32.mrb[28].mxu1 }
 0x1ba   :  { %v3008_v62 = vpop.f32.mrb[29].mxu1 }
 0x1bb   :  { %v3010_v63 = vpop.f32.mrb[30].mxu1 }
 0x1bc   :  { %v3012_v0 = vpop.f32.mrb[31].mxu1 }
 0x1df   :  { %v1407_v1 = vpop.f32.mrb[0].mxu0 }
 0x1e0   :  { %v2387_v2 = vadd.f32 %v1407_v1, %v1068_v32  ;;  %v1409_v3 = vpop.f32.mrb[1].mxu0 }
 0x1e1   :  { %v2388_v4 = vadd.f32 %v1409_v3, %v1070_v33  ;;  %v1411_v5 = vpop.f32.mrb[2].mxu0  ;;  %v2740_v3 = vld [vmem:[#allocation8 + $0x18] sm:$0xff]  }
 0x1e2   :  { %v2389_v6 = vadd.f32 %v1411_v5, %v1072_v34  ;;  %v1413_v7 = vpop.f32.mrb[3].mxu0  ;;  %v1486_v9 = vmax.f32 %v2387_v2, 0.0  ;;  %v2738_v34 = vld [vmem:[#allocation8 + $0x10] sm:$0xff]  }
 0x1e3   :  { %v2390_v8 = vadd.f32 %v1413_v7, %v1074_v35  ;;  %v1487_v11 = vmax.f32 %v2388_v4, 0.0 }
 0x1e4   :  { %v1488_v10 = vmax.f32 %v2389_v6, 0.0  ;;  %v2741_v6 = vld [vmem:[#allocation8 + $0x60] sm:$0xff]  }
 0x1e5   :  { %v1489_v12 = vmax.f32 %v2390_v8, 0.0 }
 0x1e6   :  { %v1518_v13 = vpack.c.bf16 %v1488_v10, %v1486_v9 }
 0x1e7   :  { %v1519_v14 = vpack.c.bf16 %v1489_v12, %v1487_v11  ;;  %v1417_v15 = vpop.f32.mrb[4].mxu0  ;;  %v2743_v12 = vld [vmem:[#allocation8 + $0x68] sm:$0xff]  }
 0x1e8   :  { %v2391_v17 = vadd.f32 %v1417_v15, %v1078_v36  ;;  %v1419_v18 = vpop.f32.mrb[5].mxu0 }
 0x1e9   :  { %v2392_v20 = vadd.f32 %v1419_v18, %v1080_v37  ;;  %v1421_v21 = vpop.f32.mrb[6].mxu0  ;;  %1758 = vmatprep.mubr.bf16.mxu1 %v1519_v14  ;;  %v2739_v37 = vld [vmem:[#allocation8 + $0x58] sm:$0xff]  }
 0x1ea   :  { %v2393_v22 = vadd.f32 %v1421_v21, %v1082_v38  ;;  %v1423_v23 = vpop.f32.mrb[7].mxu0  ;;  %1759 = vmatmul.mubr.bf16.vlgmr.msra.gmra.mrb[32].mxu1 %v1518_v13  ;;  %v1490_v26 = vmax.f32 %v2391_v17, 0.0  ;;  %v2744_v17 = vld [vmem:[#allocation8 + $0x28] sm:$0xff]  }
 0x1eb   :  { %v2394_v24 = vadd.f32 %v1423_v23, %v1084_v39  ;;  %2324 = vmatpush3.bf16.msra.mxu1 %v2734_v16  ;;  %v1491_v29 = vmax.f32 %v2392_v20, 0.0  ;;  %v2745_v20 = vld [vmem:[#allocation8 + $0x70] sm:$0xff]  }
 0x1ec   :  { %v1492_v27 = vmax.f32 %v2393_v22, 0.0  ;;  %2325 = vmatprep.subr.bf16.mxu1 %v2735_v19 }
 0x1ed   :  { %v1493_v30 = vmax.f32 %v2394_v24, 0.0 }
 0x1ee   :  { %v1520_v31 = vpack.c.bf16 %v1492_v27, %v1490_v26 }
 0x1ef   :  { %v1521_v32 = vpack.c.bf16 %v1493_v30, %v1491_v29  ;;  %v1427_v33 = vpop.f32.mrb[8].mxu0  ;;  %2326 = vmatpush3.bf16.msra.mxu1 %v2736_v25 }
 0x1f0   :  { %v2395_v35 = vadd.f32 %v1427_v33, %v2966_v41  ;;  %v1429_v36 = vpop.f32.mrb[9].mxu0  ;;  %2327 = vmatprep.subr.bf16.mxu1 %v2737_v28 }
 0x1f1   :  { %v2396_v38 = vadd.f32 %v1429_v36, %v2968_v42  ;;  %v1431_v39 = vpop.f32.mrb[10].mxu0  ;;  %1768 = vmatprep.mubr.bf16.mxu1 %v1521_v32  ;;  %v2742_v42 = vld [vmem:[#allocation8 + $0x20] sm:$0xff]  }
 0x1f2   :  { %v2397_v40 = vadd.f32 %v1431_v39, %v2970_v43  ;;  %v1433_v1 = vpop.f32.mrb[11].mxu0  ;;  %1769 = vmatmul.mubr.bf16.gmra.mrb[36].mxu1 %v1520_v31  ;;  %v1494_v4 = vmax.f32 %v2395_v35, 0.0 }
 0x1f3   :  { %v2398_v2 = vadd.f32 %v1433_v1, %v2972_v44  ;;  %2328 = vmatpush3.bf16.msra.mxu1 %v2738_v34  ;;  %v1495_v41 = vmax.f32 %v2396_v38, 0.0 }
 0x1f4   :  { %v1496_v5 = vmax.f32 %v2397_v40, 0.0  ;;  %2329 = vmatprep.subr.bf16.mxu1 %v2739_v37 }
 0x1f5   :  { %v1497_v7 = vmax.f32 %v2398_v2, 0.0 }
 0x1f6   :  { %v1522_v8 = vpack.c.bf16 %v1496_v5, %v1494_v4 }
 0x1f7   :  { %v1523_v9 = vpack.c.bf16 %v1497_v7, %v1495_v41  ;;  %v1437_v10 = vpop.f32.mrb[12].mxu0  ;;  %2330 = vmatpush3.bf16.msra.mxu1 %v2740_v3 }
 0x1f8   :  { %v2399_v11 = vadd.f32 %v1437_v10, %v2974_v45  ;;  %v1439_v43 = vpop.f32.mrb[13].mxu0  ;;  %2331 = vmatprep.subr.bf16.mxu1 %v2741_v6 }
 0x1f9   :  { %v2400_v44 = vadd.f32 %v1439_v43, %v2976_v46  ;;  %v1441_v13 = vpop.f32.mrb[14].mxu0  ;;  %1778 = vmatprep.mubr.bf16.mxu1 %v1523_v9  ;;  %v2746_v46 = vld [vmem:[#allocation8 + $0x30] sm:$0xff]  }
 0x1fa   :  { %v2401_v14 = vadd.f32 %v1441_v13, %v2978_v47  ;;  %v1443_v15 = vpop.f32.mrb[15].mxu0  ;;  %1779 = vmatmul.mubr.bf16.gmra.mrb[40].mxu1 %v1522_v8  ;;  %v1498_v18 = vmax.f32 %v2399_v11, 0.0 }
 0x1fb   :  { %v2402_v16 = vadd.f32 %v1443_v15, %v2980_v48  ;;  %2332 = vmatpush3.bf16.msra.mxu1 %v2742_v42  ;;  %v1499_v45 = vmax.f32 %v2400_v44, 0.0 }
 0x1fc   :  { %v1500_v19 = vmax.f32 %v2401_v14, 0.0  ;;  %2333 = vmatprep.subr.bf16.mxu1 %v2743_v12 }
 0x1fd   :  { %v1501_v21 = vmax.f32 %v2402_v16, 0.0 }
 0x1fe   :  { %v1524_v22 = vpack.c.bf16 %v1500_v19, %v1498_v18 }
 0x1ff   :  { %v1525_v23 = vpack.c.bf16 %v1501_v21, %v1499_v45  ;;  %v1447_v24 = vpop.f32.mrb[16].mxu0  ;;  %2334 = vmatpush3.bf16.msra.mxu1 %v2744_v17  ;;  %v2748_v21 = vld [vmem:[#allocation8 + $0x38] sm:$0xff]  }
 0x200   :  { %v2403_v25 = vadd.f32 %v1447_v24, %v2982_v49  ;;  %v1449_v47 = vpop.f32.mrb[17].mxu0  ;;  %2335 = vmatprep.subr.bf16.mxu1 %v2745_v20 }
 0x201   :  { %v2404_v26 = vadd.f32 %v1449_v47, %v2984_v50  ;;  %v1451_v48 = vpop.f32.mrb[18].mxu0  ;;  %1788 = vmatprep.mubr.bf16.mxu1 %v1525_v23 }
 0x202   :  { %v2405_v27 = vadd.f32 %v1451_v48, %v2986_v51  ;;  %v1453_v28 = vpop.f32.mrb[19].mxu0  ;;  %1789 = vmatmul.mubr.bf16.gmra.mrb[44].mxu1 %v1524_v22  ;;  %v1502_v30 = vmax.f32 %v2403_v25, 0.0 }
 0x203   :  { %v2406_v29 = vadd.f32 %v1453_v28, %v2988_v52  ;;  %2336 = vmatpush3.bf16.msra.mxu1 %v2746_v46  ;;  %v1503_v32 = vmax.f32 %v2404_v26, 0.0 }
 0x204   :  { %v1504_v31 = vmax.f32 %v2405_v27, 0.0 }
 0x205   :  { %v1505_v33 = vmax.f32 %v2406_v29, 0.0 }
 0x206   :  { %v1526_v34 = vpack.c.bf16 %v1504_v31, %v1502_v30 }
 0x207   :  { %v1527_v35 = vpack.c.bf16 %v1505_v33, %v1503_v32  ;;  %v1457_v49 = vpop.f32.mrb[20].mxu0 }
 0x208   :  { %v2407_v36 = vadd.f32 %v1457_v49, %v2990_v53  ;;  %v1459_v37 = vpop.f32.mrb[21].mxu0 }
 0x209   :  { %v2408_v50 = vadd.f32 %v1459_v37, %v2992_v54  ;;  %v1461_v38 = vpop.f32.mrb[22].mxu0  ;;  %1798 = vmatprep.mubr.bf16.mxu1 %v1527_v35 }
 0x20a   :  { %v2409_v51 = vadd.f32 %v1461_v38, %v2994_v55  ;;  %v1463_v39 = vpop.f32.mrb[23].mxu0  ;;  %1799 = vmatmul.mubr.bf16.gmra.mrb[48].mxu1 %v1526_v34  ;;  %v1506_v40 = vmax.f32 %v2407_v36, 0.0 }
 0x20b   :  { %v2410_v52 = vadd.f32 %v1463_v39, %v2996_v56  ;;  %v1507_v2 = vmax.f32 %v2408_v50, 0.0 }
 0x20c   :  { %v1508_v1 = vmax.f32 %v2409_v51, 0.0 }
 0x20d   :  { %v1509_v3 = vmax.f32 %v2410_v52, 0.0 }
 0x20e   :  { %v1528_v4 = vpack.c.bf16 %v1508_v1, %v1506_v40 }
 0x20f   :  { %v1529_v5 = vpack.c.bf16 %v1509_v3, %v1507_v2  ;;  %v1467_v6 = vpop.f32.mrb[24].mxu0 }
 0x210   :  { %v2411_v53 = vadd.f32 %v1467_v6, %v2998_v57  ;;  %v1469_v41 = vpop.f32.mrb[25].mxu0 }
 0x211   :  { %v2412_v54 = vadd.f32 %v1469_v41, %v3000_v58  ;;  %v1471_v7 = vpop.f32.mrb[26].mxu0  ;;  %1808 = vmatprep.mubr.bf16.mxu1 %v1529_v5 }
 0x212   :  { %v2413_v55 = vadd.f32 %v1471_v7, %v3002_v59  ;;  %v1473_v8 = vpop.f32.mrb[27].mxu0  ;;  %1809 = vmatmul.mubr.bf16.gmra.mrb[52].mxu1 %v1528_v4  ;;  %v1510_v9 = vmax.f32 %v2411_v53, 0.0 }
 0x213   :  { %v2414_v56 = vadd.f32 %v1473_v8, %v3004_v60  ;;  %v1511_v42 = vmax.f32 %v2412_v54, 0.0 }
 0x214   :  { %v1512_v10 = vmax.f32 %v2413_v55, 0.0 }
 0x215   :  { %v1513_v11 = vmax.f32 %v2414_v56, 0.0 }
 0x216   :  { %v1530_v43 = vpack.c.bf16 %v1512_v10, %v1510_v9 }
 0x217   :  { %v1531_v12 = vpack.c.bf16 %v1513_v11, %v1511_v42  ;;  %v1477_v44 = vpop.f32.mrb[28].mxu0 }
 0x218   :  { %v2415_v57 = vadd.f32 %v1477_v44, %v3006_v61  ;;  %v1479_v13 = vpop.f32.mrb[29].mxu0  ;;  %v2747_v61 = vld [vmem:[#allocation8 + $0x78] sm:$0xff]  }
 0x219   :  { %v2416_v58 = vadd.f32 %v1479_v13, %v3008_v62  ;;  %v1481_v14 = vpop.f32.mrb[30].mxu0  ;;  %1818 = vmatprep.mubr.bf16.mxu1 %v1531_v12  ;;  %2337 = vmatprep.subr.bf16.mxu1 %v2747_v61 }
 0x21a   :  { %v2417_v59 = vadd.f32 %v1481_v14, %v3010_v63  ;;  %v1483_v15 = vpop.f32.mrb[31].mxu0  ;;  %1819 = vmatmul.mubr.bf16.gmra.mrb[56].mxu1 %v1530_v43  ;;  %v1514_v16 = vmax.f32 %v2415_v57, 0.0 }
 0x21b   :  { %v2418_v60 = vadd.f32 %v1483_v15, %v3012_v0  ;;  %v1515_v18 = vmax.f32 %v2416_v58, 0.0  ;;  %2338 = vmatpush3.bf16.msra.mxu1 %v2748_v21 }
 0x21c   :  { %v1516_v17 = vmax.f32 %v2417_v59, 0.0 }
 0x21d   :  { %v1517_v19 = vmax.f32 %v2418_v60, 0.0 }
 0x21e   :  { %v1532_v20 = vpack.c.bf16 %v1516_v17, %v1514_v16 }
 0x21f   :  { %v1533_v45 = vpack.c.bf16 %v1517_v19, %v1515_v18 }
 0x221   :  { %1828 = vmatprep.mubr.bf16.mxu1 %v1533_v45 }
 0x222   :  { %1829 = vmatmul.mubr.bf16.gmra.mrb[60].mxu1 %v1532_v20 }
 0x2bd   :  { %v1760_v62 = vpop.f32.mrb[32].mxu1 }
 0x2be   :  { %v1762_v22 = vpop.f32.mrb[33].mxu1  ;;  %v1839_v63 = vmax.f32 %v1760_v62, 0.0 }
 0x2bf   :  { %v1764_v23 = vpop.f32.mrb[34].mxu1  ;;  %v1840_v25 = vmax.f32 %v1762_v22, 0.0 }
 0x2c0   :  { %v1841_v24 = vmax.f32 %v1764_v23, 0.0  ;;  %v1766_v46 = vpop.f32.mrb[35].mxu1 }
 0x2c1   :  { %v1842_v0 = vmax.f32 %v1766_v46, 0.0 }
 0x2c2   :  { %v1871_v47 = vpack.c.bf16 %v1841_v24, %v1839_v63 }
 0x2c3   :  { %v1872_v26 = vpack.c.bf16 %v1842_v0, %v1840_v25 }
 0x2c5   :  { %v1770_v48 = vpop.f32.mrb[36].mxu1  ;;  %2047 = vmatprep.mubr.bf16.mxu1 %v1872_v26 }
 0x2c6   :  { %v1772_v27 = vpop.f32.mrb[37].mxu1  ;;  %2048 = vmatmul.mubr.bf16.vlgmr.msra.gmra.mrb[64].mxu1 %v1871_v47  ;;  %v1843_v29 = vmax.f32 %v1770_v48, 0.0 }
 0x2c7   :  { %v1774_v28 = vpop.f32.mrb[38].mxu1  ;;  %v1844_v32 = vmax.f32 %v1772_v27, 0.0 }
 0x2c8   :  { %v1845_v30 = vmax.f32 %v1774_v28, 0.0  ;;  %v1776_v31 = vpop.f32.mrb[39].mxu1 }
 0x2c9   :  { %v1846_v33 = vmax.f32 %v1776_v31, 0.0 }
 0x2ca   :  { %v1873_v34 = vpack.c.bf16 %v1845_v30, %v1843_v29 }
 0x2cb   :  { %v1874_v35 = vpack.c.bf16 %v1846_v33, %v1844_v32 }
 0x2cd   :  { %v1780_v49 = vpop.f32.mrb[40].mxu1  ;;  %2055 = vmatprep.mubr.bf16.mxu1 %v1874_v35 }
 0x2ce   :  { %v1782_v36 = vpop.f32.mrb[41].mxu1  ;;  %2056 = vmatmul.mubr.bf16.gmra.mrb[68].mxu1 %v1873_v34  ;;  %v1847_v50 = vmax.f32 %v1780_v49, 0.0 }
 0x2cf   :  { %v1784_v37 = vpop.f32.mrb[42].mxu1  ;;  %v1848_v39 = vmax.f32 %v1782_v36, 0.0 }
 0x2d0   :  { %v1849_v38 = vmax.f32 %v1784_v37, 0.0  ;;  %v1786_v51 = vpop.f32.mrb[43].mxu1 }
 0x2d1   :  { %v1850_v52 = vmax.f32 %v1786_v51, 0.0 }
 0x2d2   :  { %v1875_v40 = vpack.c.bf16 %v1849_v38, %v1847_v50 }
 0x2d3   :  { %v1876_v1 = vpack.c.bf16 %v1850_v52, %v1848_v39 }
 0x2d5   :  { %v1790_v2 = vpop.f32.mrb[44].mxu1  ;;  %2063 = vmatprep.mubr.bf16.mxu1 %v1876_v1 }
 0x2d6   :  { %v1792_v3 = vpop.f32.mrb[45].mxu1  ;;  %2064 = vmatmul.mubr.bf16.gmra.mrb[72].mxu1 %v1875_v40  ;;  %v1851_v5 = vmax.f32 %v1790_v2, 0.0 }
 0x2d7   :  { %v1794_v4 = vpop.f32.mrb[46].mxu1  ;;  %v1852_v41 = vmax.f32 %v1792_v3, 0.0 }
 0x2d8   :  { %v1853_v6 = vmax.f32 %v1794_v4, 0.0  ;;  %v1796_v53 = vpop.f32.mrb[47].mxu1 }
 0x2d9   :  { %v1854_v54 = vmax.f32 %v1796_v53, 0.0 }
 0x2da   :  { %v1877_v7 = vpack.c.bf16 %v1853_v6, %v1851_v5 }
 0x2db   :  { %v1878_v55 = vpack.c.bf16 %v1854_v54, %v1852_v41 }
 0x2dd   :  { %v1800_v8 = vpop.f32.mrb[48].mxu1  ;;  %2071 = vmatprep.mubr.bf16.mxu1 %v1878_v55 }
 0x2de   :  { %v1802_v56 = vpop.f32.mrb[49].mxu1  ;;  %2072 = vmatmul.mubr.bf16.gmra.mrb[76].mxu1 %v1877_v7  ;;  %v1855_v10 = vmax.f32 %v1800_v8, 0.0 }
 0x2df   :  { %v1804_v9 = vpop.f32.mrb[50].mxu1  ;;  %v1856_v43 = vmax.f32 %v1802_v56, 0.0 }
 0x2e0   :  { %v1857_v42 = vmax.f32 %v1804_v9, 0.0  ;;  %v1806_v11 = vpop.f32.mrb[51].mxu1 }
 0x2e1   :  { %v1858_v12 = vmax.f32 %v1806_v11, 0.0 }
 0x2e2   :  { %v1879_v44 = vpack.c.bf16 %v1857_v42, %v1855_v10 }
 0x2e3   :  { %v1880_v57 = vpack.c.bf16 %v1858_v12, %v1856_v43 }
 0x2e5   :  { %v1810_v13 = vpop.f32.mrb[52].mxu1  ;;  %2079 = vmatprep.mubr.bf16.mxu1 %v1880_v57 }
 0x2e6   :  { %v1812_v58 = vpop.f32.mrb[53].mxu1  ;;  %2080 = vmatmul.mubr.bf16.gmra.mrb[80].mxu1 %v1879_v44  ;;  %v1859_v59 = vmax.f32 %v1810_v13, 0.0 }
 0x2e7   :  { %v1814_v14 = vpop.f32.mrb[54].mxu1  ;;  %v1860_v16 = vmax.f32 %v1812_v58, 0.0 }
 0x2e8   :  { %v1861_v15 = vmax.f32 %v1814_v14, 0.0  ;;  %v1816_v60 = vpop.f32.mrb[55].mxu1 }
 0x2e9   :  { %v1862_v17 = vmax.f32 %v1816_v60, 0.0 }
 0x2ea   :  { %v1881_v18 = vpack.c.bf16 %v1861_v15, %v1859_v59 }
 0x2eb   :  { %v1882_v19 = vpack.c.bf16 %v1862_v17, %v1860_v16 }
 0x2ed   :  { %v1820_v20 = vpop.f32.mrb[56].mxu1  ;;  %2087 = vmatprep.mubr.bf16.mxu1 %v1882_v19 }
 0x2ee   :  { %v1822_v45 = vpop.f32.mrb[57].mxu1  ;;  %2088 = vmatmul.mubr.bf16.gmra.mrb[84].mxu1 %v1881_v18  ;;  %v1863_v21 = vmax.f32 %v1820_v20, 0.0 }
 0x2ef   :  { %v1824_v61 = vpop.f32.mrb[58].mxu1  ;;  %v1864_v23 = vmax.f32 %v1822_v45, 0.0 }
 0x2f0   :  { %v1865_v62 = vmax.f32 %v1824_v61, 0.0  ;;  %v1826_v22 = vpop.f32.mrb[59].mxu1 }
 0x2f1   :  { %v1866_v63 = vmax.f32 %v1826_v22, 0.0 }
 0x2f2   :  { %v1883_v24 = vpack.c.bf16 %v1865_v62, %v1863_v21 }
 0x2f3   :  { %v1884_v46 = vpack.c.bf16 %v1866_v63, %v1864_v23 }
 0x2f5   :  { %v1830_v25 = vpop.f32.mrb[60].mxu1  ;;  %2095 = vmatprep.mubr.bf16.mxu1 %v1884_v46 }
 0x2f6   :  { %v1832_v0 = vpop.f32.mrb[61].mxu1  ;;  %2096 = vmatmul.mubr.bf16.gmra.mrb[88].mxu1 %v1883_v24  ;;  %v1867_v26 = vmax.f32 %v1830_v25, 0.0 }
 0x2f7   :  { %v1834_v47 = vpop.f32.mrb[62].mxu1  ;;  %v1868_v28 = vmax.f32 %v1832_v0, 0.0 }
 0x2f8   :  { %v1869_v48 = vmax.f32 %v1834_v47, 0.0  ;;  %v1836_v27 = vpop.f32.mrb[63].mxu1 }
 0x2f9   :  { %v1870_v29 = vmax.f32 %v1836_v27, 0.0 }
 0x2fa   :  { %v1885_v30 = vpack.c.bf16 %v1869_v48, %v1867_v26 }
 0x2fb   :  { %v1886_v31 = vpack.c.bf16 %v1870_v29, %v1868_v28 }
 0x2fd   :  { %2103 = vmatprep.mubr.bf16.mxu1 %v1886_v31 }
 0x2fe   :  { %2104 = vmatmul.mubr.bf16.gmra.mrb[92].mxu1 %v1885_v30 }
 0x399   :  { %v2339_v32 = vpop.f32.mrb[64].mxu1 }
 0x39a   :  { %v2340_v33 = vpop.f32.mrb[65].mxu1 }
 0x39b   :  { %v2341_v34 = vadd.f32 %v2340_v33, %v2339_v32  ;;  %v2342_v35 = vpop.f32.mrb[66].mxu1 }
 0x39c   :  { %v2343_v49 = vpop.f32.mrb[67].mxu1 }
 0x39d   :  { %2112 = vst [vmem:[#allocation10] sm:$0xff] %v2341_v34  ;;  %v2344_v36 = vadd.f32 %v2343_v49, %v2342_v35 }
 0x39f   :  { %2113 = vst [vmem:[#allocation10 + $0x8] sm:$0xff] %v2344_v36 }
 0x3a1   :  { %v2345_v37 = vpop.f32.mrb[68].mxu1 }
 0x3a2   :  { %v2346_v50 = vpop.f32.mrb[69].mxu1 }
 0x3a3   :  { %v2347_v38 = vadd.f32 %v2346_v50, %v2345_v37  ;;  %v2348_v51 = vpop.f32.mrb[70].mxu1 }
 0x3a4   :  { %v2349_v39 = vpop.f32.mrb[71].mxu1 }
 0x3a5   :  { %2114 = vst [vmem:[#allocation10 + $0x10] sm:$0xff] %v2347_v38  ;;  %v2350_v52 = vadd.f32 %v2349_v39, %v2348_v51 }
 0x3a7   :  { %2115 = vst [vmem:[#allocation10 + $0x18] sm:$0xff] %v2350_v52 }
 0x3a9   :  { %v2351_v40 = vpop.f32.mrb[72].mxu1 }
 0x3aa   :  { %v2352_v1 = vpop.f32.mrb[73].mxu1 }
 0x3ab   :  { %v2353_v2 = vadd.f32 %v2352_v1, %v2351_v40  ;;  %v2354_v3 = vpop.f32.mrb[74].mxu1 }
 0x3ac   :  { %v2355_v4 = vpop.f32.mrb[75].mxu1 }
 0x3ad   :  { %2116 = vst [vmem:[#allocation10 + $0x20] sm:$0xff] %v2353_v2  ;;  %v2356_v5 = vadd.f32 %v2355_v4, %v2354_v3 }
 0x3af   :  { %2117 = vst [vmem:[#allocation10 + $0x28] sm:$0xff] %v2356_v5 }
 0x3b1   :  { %v2357_v6 = vpop.f32.mrb[76].mxu1 }
 0x3b2   :  { %v2358_v53 = vpop.f32.mrb[77].mxu1 }
 0x3b3   :  { %v2359_v41 = vadd.f32 %v2358_v53, %v2357_v6  ;;  %v2360_v54 = vpop.f32.mrb[78].mxu1 }
 0x3b4   :  { %v2361_v7 = vpop.f32.mrb[79].mxu1 }
 0x3b5   :  { %2118 = vst [vmem:[#allocation10 + $0x30] sm:$0xff] %v2359_v41  ;;  %v2362_v55 = vadd.f32 %v2361_v7, %v2360_v54 }
 0x3b7   :  { %2119 = vst [vmem:[#allocation10 + $0x38] sm:$0xff] %v2362_v55 }
 0x3b9   :  { %v2363_v8 = vpop.f32.mrb[80].mxu1 }
 0x3ba   :  { %v2364_v56 = vpop.f32.mrb[81].mxu1 }
 0x3bb   :  { %v2365_v9 = vadd.f32 %v2364_v56, %v2363_v8  ;;  %v2366_v10 = vpop.f32.mrb[82].mxu1 }
 0x3bc   :  { %v2367_v42 = vpop.f32.mrb[83].mxu1 }
 0x3bd   :  { %2120 = vst [vmem:[#allocation10 + $0x40] sm:$0xff] %v2365_v9  ;;  %v2368_v11 = vadd.f32 %v2367_v42, %v2366_v10 }
 0x3bf   :  { %2121 = vst [vmem:[#allocation10 + $0x48] sm:$0xff] %v2368_v11 }
 0x3c1   :  { %v2369_v43 = vpop.f32.mrb[84].mxu1 }
 0x3c2   :  { %v2370_v12 = vpop.f32.mrb[85].mxu1 }
 0x3c3   :  { %v2371_v44 = vadd.f32 %v2370_v12, %v2369_v43  ;;  %v2372_v57 = vpop.f32.mrb[86].mxu1 }
 0x3c4   :  { %v2373_v13 = vpop.f32.mrb[87].mxu1 }
 0x3c5   :  { %2122 = vst [vmem:[#allocation10 + $0x50] sm:$0xff] %v2371_v44  ;;  %v2374_v58 = vadd.f32 %v2373_v13, %v2372_v57 }
 0x3c7   :  { %2123 = vst [vmem:[#allocation10 + $0x58] sm:$0xff] %v2374_v58 }
 0x3c9   :  { %v2375_v14 = vpop.f32.mrb[88].mxu1 }
 0x3ca   :  { %v2376_v59 = vpop.f32.mrb[89].mxu1 }
 0x3cb   :  { %v2377_v15 = vadd.f32 %v2376_v59, %v2375_v14  ;;  %v2378_v60 = vpop.f32.mrb[90].mxu1 }
 0x3cc   :  { %v2379_v16 = vpop.f32.mrb[91].mxu1 }
 0x3cd   :  { %2124 = vst [vmem:[#allocation10 + $0x60] sm:$0xff] %v2377_v15  ;;  %v2380_v17 = vadd.f32 %v2379_v16, %v2378_v60 }
 0x3cf   :  { %2125 = vst [vmem:[#allocation10 + $0x68] sm:$0xff] %v2380_v17 }
 0x3d1   :  { %v2381_v18 = vpop.f32.mrb[92].mxu1 }
 0x3d2   :  { %v2382_v19 = vpop.f32.mrb[93].mxu1 }
 0x3d3   :  { %v2383_v20 = vadd.f32 %v2382_v19, %v2381_v18  ;;  %v2384_v45 = vpop.f32.mrb[94].mxu1 }
 0x3d4   :  { %v2385_v61 = vpop.f32.mrb[95].mxu1 }
 0x3d5   :  { %2126 = vst [vmem:[#allocation10 + $0x70] sm:$0xff] %v2383_v20  ;;  %v2386_v21 = vadd.f32 %v2385_v61, %v2384_v45 }
 0x3d7   :  { %2127 = vst [vmem:[#allocation10 + $0x78] sm:$0xff] %v2386_v21 }
 0x3d8   :  { %2848 = shalt.err (!%p2845_p8)
}
 0x3d9   :  { %s2849_s18 = scalar_lea.hbm %s3057_s4, 2048 }
 0x3da   :  { %p2850_p9 = scmp.ne.s32.totalorder %s3057_s4, %s2849_s18  ;;  %p2853_p10 = scmp.lt.u32.totalorder %s2849_s18, %s3057_s4 }
 0x3dc   :  { %p2855_p11 = pnand %p2853_p10, %p2850_p9 }
 0x3de   :  { %2858 = shalt.err (!%p2855_p11)
}
 0x3df   :  { %2139 = dma.vmem_to_hbm [thread:$0]  %s2134_s13, 2048, %s3057_s4, [#allocation4], %s2868_s25, %s2868_s25, %s2869_s26  }
 0x3e0   :  { %2865 = dma.done.wait [#allocation4], 2048  }
 0x3e1   :  { %2866 = vsyncadd [#allocation4], 4294965248 }
 0x3e2   :  { %2143 = vsyncpa [#allocation3], 1 }
 0x3e3   :  { %2144 = vsyncpa [#allocation6], 1 }
 0x3e4   :  { %2145 = vsyncpa [#allocation9], 1 }
 0x3e5   :  { %2146 = vsyncpa [#allocation4], 1 }

</bundles_post_ra>
